<compile_context>
chip_gen: v6e
topology: v6e:2x2x1
jax: 0.10.0
libtpu: 0.0.40
codegen_flags: <defaults>
</compile_context>

<pallas_src>
import functools
import math

import jax
import jax.numpy as jnp
from jax.experimental import pallas as pl
from jax.experimental.pallas import tpu as pltpu

NUM_FLOWS = 4
DIM = 8                 # feature dim of x  (x has shape (m, DIM))
HALF = DIM // 2
HIDDEN = 32
LOG_2PI = math.log(2.0 * math.pi)
TILE_M = 1024           # max batch tile on the lane axis

_ACT_DTYPE = None


def _activation_dtype():
    """bf16 activations on bf16-EUP chips (v6e/v7x); f32 on v5-class chips."""
    global _ACT_DTYPE
    if _ACT_DTYPE is None:
        try:
            kind = jax.devices()[0].device_kind.lower()
        except Exception:
            kind = ""
        _ACT_DTYPE = jnp.float32 if "v5" in kind else jnp.bfloat16
    return _ACT_DTYPE


def _round_up(a, b):
    return ((a + b - 1) // b) * b


def _nf_forward_kernel(act_dtype, x_ref, w1_ref, b1_ref, w2_ref, b2_ref,
                       z_ref, stats_ref):
    """One (DIM, tile_m) batch tile through all flows + Gaussian prior log-prob."""
    x = x_ref[...]                                   # (DIM, tile_m) f32
    tile_m = x.shape[1]
    first = x[:HALF, :]                              # (HALF, tile_m)
    second = x[HALF:, :]                             # (HALF, tile_m)
    log_det = jnp.zeros((1, tile_m), jnp.float32)

    # Statically unrolled flow loop (NUM_FLOWS is a Python constant).
    for k in range(NUM_FLOWS):
        xa, xb = (first, second) if k % 2 == 0 else (second, first)

        # First conditioner layer on the VPU: K=HALF(=4) broadcast-FMAs
        # instead of a K=4 MXU dot (which would be ~all zero padding).
        w1k = w1_ref[k]                              # (2*HIDDEN, HALF) f32
        h_pre = b1_ref[k] + w1k[:, 0:1] * xa[0:1, :]     # (2*HIDDEN, tile_m)
        for j in range(1, HALF):
            h_pre = h_pre + w1k[:, j:j + 1] * xa[j:j + 1, :]

        # Dominant 64-row tanh in act_dtype (bf16 halves EUP work on v6e/v7x).
        h = jnp.tanh(h_pre.astype(act_dtype))        # (2*HIDDEN, tile_m)

        # Second (fused, block-diagonal) layer on the MXU: bf16 operands,
        # f32 accumulation.
        st = (jnp.dot(w2_ref[k], h.astype(jnp.bfloat16),
                      preferred_element_type=jnp.float32)
              + b2_ref[k])                           # (2*HALF, tile_m) f32
        s = jnp.tanh(st[:HALF, :])                   # scale (small; keep f32)
        t = st[HALF:, :]                             # translate (linear)

        yb = xb * jnp.exp(s) + t                     # affine coupling
        log_det = log_det + jnp.sum(s, axis=0, keepdims=True)

        if k % 2 == 0:
            second = yb
        else:
            first = yb

    # Store halves directly (no cross-sublane concat materialization).
    z_ref[:HALF, :] = first
    z_ref[HALF:, :] = second

    # prior = standard Normal: log N(z; 0, I) = -0.5*||z||^2 - 0.5*D*log(2*pi)
    sq = (jnp.sum(first * first, axis=0, keepdims=True)
          + jnp.sum(second * second, axis=0, keepdims=True))
    stats_ref[0:1, :] = -0.5 * sq - 0.5 * DIM * LOG_2PI
    stats_ref[1:2, :] = log_det


def _pack_params(params):
    """Repack per-flow scale/translate nets into fused, transposed weights."""
    ws1_t = jnp.swapaxes(params["ws1"], 1, 2)        # (F, HIDDEN, HALF)
    wt1_t = jnp.swapaxes(params["wt1"], 1, 2)
    w1 = jnp.concatenate([ws1_t, wt1_t], axis=1)     # (F, 2*HIDDEN, HALF)
    b1 = jnp.concatenate([jnp.swapaxes(params["bs1"], 1, 2),
                          jnp.swapaxes(params["bt1"], 1, 2)],
                         axis=1)                     # (F, 2*HIDDEN, 1)

    ws2_t = jnp.swapaxes(params["ws2"], 1, 2)        # (F, HALF, HIDDEN)
    wt2_t = jnp.swapaxes(params["wt2"], 1, 2)
    zeros = jnp.zeros_like(ws2_t)
    w2 = jnp.concatenate(
        [jnp.concatenate([ws2_t, zeros], axis=2),    # scale rows
         jnp.concatenate([zeros, wt2_t], axis=2)],   # translate rows
        axis=1)                                      # (F, 2*HALF, 2*HIDDEN)
    b2 = jnp.concatenate([jnp.swapaxes(params["bs2"], 1, 2),
                          jnp.swapaxes(params["bt2"], 1, 2)],
                         axis=1)                     # (F, 2*HALF, 1)
    # w1/b1 stay f32 (VPU FMA path); w2 in bf16 (MXU operand); b2 f32.
    return (w1.astype(jnp.float32), b1.astype(jnp.float32),
            w2.astype(jnp.bfloat16), b2.astype(jnp.float32))


@jax.jit
def normalizing_flow_forward(x, params):
    """Equivalent of NormalizingFlowModel.forward(x) -> (z, prior_logprob, log_det)."""
    m, d = x.shape
    assert d == DIM
    w1, b1, w2, b2 = _pack_params(params)
    act_dtype = _activation_dtype()

    # Lane-dense layout: batch -> lanes (fast axis), features -> sublanes.
    if m < 256:
        tile_m = max(128, _round_up(m, 128))         # single lane-aligned tile
    else:
        # >= 2 grid steps so v7x's two TensorCores both get work; cap at TILE_M.
        tile_m = min(TILE_M, _round_up(pl.cdiv(m, 2), 128))
    m_pad = _round_up(m, tile_m)

    # jnp.pad fuses into one copy (no zeros + dynamic-update-slice double write).
    xt = jnp.pad(x.astype(jnp.float32).T, ((0, 0), (0, m_pad - m)))

    def full_spec(arr):
        # Whole (tiny) parameter array as one block, resident across the grid.
        return pl.BlockSpec(arr.shape, lambda i: (0,) * arr.ndim)

    z_t, stats = pl.pallas_call(
        functools.partial(_nf_forward_kernel, act_dtype),
        out_shape=(
            jax.ShapeDtypeStruct((DIM, m_pad), jnp.float32),   # z (transposed)
            jax.ShapeDtypeStruct((2, m_pad), jnp.float32),     # [logp; log_det]
        ),
        grid_spec=pltpu.PrefetchScalarGridSpec(
            num_scalar_prefetch=0,
            grid=(m_pad // tile_m,),
            in_specs=[
                pl.BlockSpec((DIM, tile_m), lambda i: (0, i)),
                full_spec(w1), full_spec(b1), full_spec(w2), full_spec(b2),
            ],
            out_specs=[
                pl.BlockSpec((DIM, tile_m), lambda i: (0, i)),
                pl.BlockSpec((2, tile_m), lambda i: (0, i)),
            ],
        ),
        compiler_params=pltpu.CompilerParams(
            dimension_semantics=("parallel",)),
    )(xt, w1, b1, w2, b2)

    # TODO(synk): for very large m, return z in (DIM, m) layout (or fuse this
    # transpose into the consumer) to skip one full-array HBM round trip.
    z = z_t[:, :m].T                                 # back to (m, DIM)
    return z, stats[0, :m], stats[1, :m]


def init_params(key):
    """Deterministic synthetic parameter init (stacked over NUM_FLOWS)."""
    ks = jax.random.split(key, 8)

    def w(k, shape, scale=0.1):
        return (scale * jax.random.normal(k, shape)).astype(jnp.float32)

    return {
        "ws1": w(ks[0], (NUM_FLOWS, HALF, HIDDEN)),
        "bs1": w(ks[1], (NUM_FLOWS, 1, HIDDEN), 0.01),
        "ws2": w(ks[2], (NUM_FLOWS, HIDDEN, HALF)),
        "bs2": w(ks[3], (NUM_FLOWS, 1, HALF), 0.01),
        "wt1": w(ks[4], (NUM_FLOWS, HALF, HIDDEN)),
        "bt1": w(ks[5], (NUM_FLOWS, 1, HIDDEN), 0.01),
        "wt2": w(ks[6], (NUM_FLOWS, HIDDEN, HALF)),
        "bt2": w(ks[7], (NUM_FLOWS, 1, HALF), 0.01),
    }


def reference_forward(x, params):
    """Pure-JAX f32 reference mirroring the PyTorch semantics (for verification)."""
    m = x.shape[0]
    log_det = jnp.zeros((m,), jnp.float32)
    for k in range(NUM_FLOWS):
        if k % 2 == 0:
            xa, xb = x[:, :HALF], x[:, HALF:]
        else:
            xa, xb = x[:, HALF:], x[:, :HALF]
        hs = jnp.tanh(xa @ params["ws1"][k] + params["bs1"][k])
        s = jnp.tanh(hs @ params["ws2"][k] + params["bs2"][k])
        ht = jnp.tanh(xa @ params["wt1"][k] + params["bt1"][k])
        t = ht @ params["wt2"][k] + params["bt2"][k]
        yb = xb * jnp.exp(s) + t
        x = (jnp.concatenate([xa, yb], axis=1) if k % 2 == 0
             else jnp.concatenate([yb, xa], axis=1))
        log_det = log_det + jnp.sum(s, axis=1)
    prior_logprob = -0.5 * jnp.sum(x * x, axis=1) - 0.5 * DIM * LOG_2PI
    return x, prior_logprob, log_det


def _check(batch, k_x, params):
    x = jax.random.normal(k_x, (batch, DIM), dtype=jnp.float32)
    z, prior_logprob, log_det = normalizing_flow_forward(x, params)
    jax.block_until_ready((z, prior_logprob, log_det))
    z_ref, lp_ref, ld_ref = reference_forward(x, params)
    assert z.shape == (batch, DIM)
    assert prior_logprob.shape == (batch,)
    assert log_det.shape == (batch,)
    assert jnp.allclose(z, z_ref, atol=1e-2, rtol=1e-2)
    assert jnp.allclose(prior_logprob, lp_ref, atol=1e-2, rtol=1e-2)
    assert jnp.allclose(log_det, ld_ref, atol=1e-2, rtol=1e-2)


if __name__ == "__main__":
    key = jax.random.PRNGKey(0)
    k_x, k_x2, k_p = jax.random.split(key, 3)
    params = init_params(k_p)

    # Small primary check (single 128-lane tile).
    _check(8, k_x, params)
    # Batch padding + multi-step grid (2 tiles of 384 lanes; exercises the
    # two-TensorCore split path on v7x).
    _check(600, k_x2, params)

    print("KERNEL_OK")
</pallas_src>

<mosaic_0001>
module attributes {stable_mosaic.version = 11 : i64} {
  func.func @_nf_forward_kernel(%arg0: i32, %arg1: memref<8x128xf32, #tpu.memory_space<vmem>>, %arg2: memref<4x64x4xf32, #tpu.memory_space<vmem>>, %arg3: memref<4x64x1xf32, #tpu.memory_space<vmem>>, %arg4: memref<4x8x64xbf16, #tpu.memory_space<vmem>>, %arg5: memref<4x8x1xf32, #tpu.memory_space<vmem>>, %arg6: memref<8x128xf32, #tpu.memory_space<vmem>>, %arg7: memref<2x128xf32, #tpu.memory_space<vmem>>) attributes {dimension_semantics = [#tpu.dimension_semantics<parallel>], iteration_bounds = array<i64: 1>, scalar_prefetch = 0 : i64, scratch_operands = 0 : i64, tpu.core_type = #tpu.core_type<tc>, window_params = [{transform_indices = @transform_0, window_bounds = array<i64: 8, 128>}, {pipeline_mode = #tpu.pipeline_mode<synchronous>, transform_indices = @transform_1, window_bounds = array<i64: 4, 64, 4>}, {pipeline_mode = #tpu.pipeline_mode<synchronous>, transform_indices = @transform_2, window_bounds = array<i64: 4, 64, 1>}, {pipeline_mode = #tpu.pipeline_mode<synchronous>, transform_indices = @transform_3, window_bounds = array<i64: 4, 8, 64>}, {pipeline_mode = #tpu.pipeline_mode<synchronous>, transform_indices = @transform_4, window_bounds = array<i64: 4, 8, 1>}, {transform_indices = @transform_5, window_bounds = array<i64: 8, 128>}, {transform_indices = @transform_6, window_bounds = array<i64: 2, 128>}]} {
    %c0 = arith.constant 0 : index
    %c0_0 = arith.constant 0 : index
    %0 = vector.load %arg1[%c0, %c0_0] : memref<8x128xf32, #tpu.memory_space<vmem>>, vector<8x128xf32>
    %1 = vector.extract_strided_slice %0 {offsets = [0, 0], sizes = [4, 128], strides = [1, 1]} : vector<8x128xf32> to vector<4x128xf32>
    %2 = vector.extract_strided_slice %0 {offsets = [4, 0], sizes = [4, 128], strides = [1, 1]} : vector<8x128xf32> to vector<4x128xf32>
    %cst = arith.constant 0.000000e+00 : f32
    %3 = vector.broadcast %cst : f32 to vector<1x128xf32>
    %c0_1 = arith.constant 0 : index
    %c0_2 = arith.constant 0 : index
    %c0_3 = arith.constant 0 : index
    %4 = vector.load %arg2[%c0_1, %c0_2, %c0_3] : memref<4x64x4xf32, #tpu.memory_space<vmem>>, vector<1x64x4xf32>
    %5 = vector.shape_cast %4 : vector<1x64x4xf32> to vector<64x4xf32>
    %c0_4 = arith.constant 0 : index
    %c0_5 = arith.constant 0 : index
    %c0_6 = arith.constant 0 : index
    %6 = vector.load %arg3[%c0_4, %c0_5, %c0_6] : memref<4x64x1xf32, #tpu.memory_space<vmem>>, vector<1x64x1xf32>
    %7 = vector.shape_cast %6 : vector<1x64x1xf32> to vector<64x1xf32>
    %8 = vector.extract_strided_slice %5 {offsets = [0, 0], sizes = [64, 1], strides = [1, 1]} : vector<64x4xf32> to vector<64x1xf32>
    %9 = vector.extract_strided_slice %1 {offsets = [0, 0], sizes = [1, 128], strides = [1, 1]} : vector<4x128xf32> to vector<1x128xf32>
    %10 = vector.broadcast %8 : vector<64x1xf32> to vector<64x128xf32>
    %11 = vector.broadcast %9 : vector<1x128xf32> to vector<64x128xf32>
    %12 = arith.mulf %10, %11 : vector<64x128xf32>
    %13 = vector.broadcast %7 : vector<64x1xf32> to vector<64x128xf32>
    %14 = arith.addf %13, %12 : vector<64x128xf32>
    %15 = vector.extract_strided_slice %5 {offsets = [0, 1], sizes = [64, 1], strides = [1, 1]} : vector<64x4xf32> to vector<64x1xf32>
    %16 = vector.extract_strided_slice %1 {offsets = [1, 0], sizes = [1, 128], strides = [1, 1]} : vector<4x128xf32> to vector<1x128xf32>
    %17 = vector.broadcast %15 : vector<64x1xf32> to vector<64x128xf32>
    %18 = vector.broadcast %16 : vector<1x128xf32> to vector<64x128xf32>
    %19 = arith.mulf %17, %18 : vector<64x128xf32>
    %20 = arith.addf %14, %19 : vector<64x128xf32>
    %21 = vector.extract_strided_slice %5 {offsets = [0, 2], sizes = [64, 1], strides = [1, 1]} : vector<64x4xf32> to vector<64x1xf32>
    %22 = vector.extract_strided_slice %1 {offsets = [2, 0], sizes = [1, 128], strides = [1, 1]} : vector<4x128xf32> to vector<1x128xf32>
    %23 = vector.broadcast %21 : vector<64x1xf32> to vector<64x128xf32>
    %24 = vector.broadcast %22 : vector<1x128xf32> to vector<64x128xf32>
    %25 = arith.mulf %23, %24 : vector<64x128xf32>
    %26 = arith.addf %20, %25 : vector<64x128xf32>
    %27 = vector.extract_strided_slice %5 {offsets = [0, 3], sizes = [64, 1], strides = [1, 1]} : vector<64x4xf32> to vector<64x1xf32>
    %28 = vector.extract_strided_slice %1 {offsets = [3, 0], sizes = [1, 128], strides = [1, 1]} : vector<4x128xf32> to vector<1x128xf32>
    %29 = vector.broadcast %27 : vector<64x1xf32> to vector<64x128xf32>
    %30 = vector.broadcast %28 : vector<1x128xf32> to vector<64x128xf32>
    %31 = arith.mulf %29, %30 : vector<64x128xf32>
    %32 = arith.addf %26, %31 : vector<64x128xf32>
    %33 = arith.truncf %32 : vector<64x128xf32> to vector<64x128xbf16>
    %34 = math.tanh %33 : vector<64x128xbf16>
    %c0_7 = arith.constant 0 : index
    %c0_8 = arith.constant 0 : index
    %c0_9 = arith.constant 0 : index
    %35 = vector.load %arg4[%c0_7, %c0_8, %c0_9] : memref<4x8x64xbf16, #tpu.memory_space<vmem>>, vector<1x8x64xbf16>
    %36 = vector.shape_cast %35 : vector<1x8x64xbf16> to vector<8x64xbf16>
    %cst_10 = arith.constant dense<0.000000e+00> : vector<8x128xf32>
    %37 = tpu.matmul %36, %34, %cst_10 {dimension_numbers = #tpu.dot_dimension_numbers<[1], [0], [0], [1], [0, 0, 1, 1], [], []>} : vector<8x64xbf16>, vector<64x128xbf16>, vector<8x128xf32> -> vector<8x128xf32>
    %c0_11 = arith.constant 0 : index
    %c0_12 = arith.constant 0 : index
    %c0_13 = arith.constant 0 : index
    %38 = vector.load %arg5[%c0_11, %c0_12, %c0_13] : memref<4x8x1xf32, #tpu.memory_space<vmem>>, vector<1x8x1xf32>
    %39 = vector.shape_cast %38 : vector<1x8x1xf32> to vector<8x1xf32>
    %40 = vector.broadcast %39 : vector<8x1xf32> to vector<8x128xf32>
    %41 = arith.addf %37, %40 : vector<8x128xf32>
    %42 = vector.extract_strided_slice %41 {offsets = [0, 0], sizes = [4, 128], strides = [1, 1]} : vector<8x128xf32> to vector<4x128xf32>
    %43 = math.tanh %42 : vector<4x128xf32>
    %44 = vector.extract_strided_slice %41 {offsets = [4, 0], sizes = [4, 128], strides = [1, 1]} : vector<8x128xf32> to vector<4x128xf32>
    %45 = math.exp %43 : vector<4x128xf32>
    %46 = arith.mulf %2, %45 : vector<4x128xf32>
    %47 = arith.addf %46, %44 : vector<4x128xf32>
    %cst_14 = arith.constant dense<0.000000e+00> : vector<128xf32>
    %48 = vector.multi_reduction <add>, %43, %cst_14 [0] : vector<4x128xf32> to vector<128xf32>
    %49 = vector.shape_cast %48 : vector<128xf32> to vector<1x128xf32>
    %50 = arith.addf %3, %49 : vector<1x128xf32>
    %c1 = arith.constant 1 : index
    %c0_15 = arith.constant 0 : index
    %c0_16 = arith.constant 0 : index
    %51 = vector.load %arg2[%c1, %c0_15, %c0_16] : memref<4x64x4xf32, #tpu.memory_space<vmem>>, vector<1x64x4xf32>
    %52 = vector.shape_cast %51 : vector<1x64x4xf32> to vector<64x4xf32>
    %c1_17 = arith.constant 1 : index
    %c0_18 = arith.constant 0 : index
    %c0_19 = arith.constant 0 : index
    %53 = vector.load %arg3[%c1_17, %c0_18, %c0_19] : memref<4x64x1xf32, #tpu.memory_space<vmem>>, vector<1x64x1xf32>
    %54 = vector.shape_cast %53 : vector<1x64x1xf32> to vector<64x1xf32>
    %55 = vector.extract_strided_slice %52 {offsets = [0, 0], sizes = [64, 1], strides = [1, 1]} : vector<64x4xf32> to vector<64x1xf32>
    %56 = vector.extract_strided_slice %47 {offsets = [0, 0], sizes = [1, 128], strides = [1, 1]} : vector<4x128xf32> to vector<1x128xf32>
    %57 = vector.broadcast %55 : vector<64x1xf32> to vector<64x128xf32>
    %58 = vector.broadcast %56 : vector<1x128xf32> to vector<64x128xf32>
    %59 = arith.mulf %57, %58 : vector<64x128xf32>
    %60 = vector.broadcast %54 : vector<64x1xf32> to vector<64x128xf32>
    %61 = arith.addf %60, %59 : vector<64x128xf32>
    %62 = vector.extract_strided_slice %52 {offsets = [0, 1], sizes = [64, 1], strides = [1, 1]} : vector<64x4xf32> to vector<64x1xf32>
    %63 = vector.extract_strided_slice %47 {offsets = [1, 0], sizes = [1, 128], strides = [1, 1]} : vector<4x128xf32> to vector<1x128xf32>
    %64 = vector.broadcast %62 : vector<64x1xf32> to vector<64x128xf32>
    %65 = vector.broadcast %63 : vector<1x128xf32> to vector<64x128xf32>
    %66 = arith.mulf %64, %65 : vector<64x128xf32>
    %67 = arith.addf %61, %66 : vector<64x128xf32>
    %68 = vector.extract_strided_slice %52 {offsets = [0, 2], sizes = [64, 1], strides = [1, 1]} : vector<64x4xf32> to vector<64x1xf32>
    %69 = vector.extract_strided_slice %47 {offsets = [2, 0], sizes = [1, 128], strides = [1, 1]} : vector<4x128xf32> to vector<1x128xf32>
    %70 = vector.broadcast %68 : vector<64x1xf32> to vector<64x128xf32>
    %71 = vector.broadcast %69 : vector<1x128xf32> to vector<64x128xf32>
    %72 = arith.mulf %70, %71 : vector<64x128xf32>
    %73 = arith.addf %67, %72 : vector<64x128xf32>
    %74 = vector.extract_strided_slice %52 {offsets = [0, 3], sizes = [64, 1], strides = [1, 1]} : vector<64x4xf32> to vector<64x1xf32>
    %75 = vector.extract_strided_slice %47 {offsets = [3, 0], sizes = [1, 128], strides = [1, 1]} : vector<4x128xf32> to vector<1x128xf32>
    %76 = vector.broadcast %74 : vector<64x1xf32> to vector<64x128xf32>
    %77 = vector.broadcast %75 : vector<1x128xf32> to vector<64x128xf32>
    %78 = arith.mulf %76, %77 : vector<64x128xf32>
    %79 = arith.addf %73, %78 : vector<64x128xf32>
    %80 = arith.truncf %79 : vector<64x128xf32> to vector<64x128xbf16>
    %81 = math.tanh %80 : vector<64x128xbf16>
    %c1_20 = arith.constant 1 : index
    %c0_21 = arith.constant 0 : index
    %c0_22 = arith.constant 0 : index
    %82 = vector.load %arg4[%c1_20, %c0_21, %c0_22] : memref<4x8x64xbf16, #tpu.memory_space<vmem>>, vector<1x8x64xbf16>
    %83 = vector.shape_cast %82 : vector<1x8x64xbf16> to vector<8x64xbf16>
    %cst_23 = arith.constant dense<0.000000e+00> : vector<8x128xf32>
    %84 = tpu.matmul %83, %81, %cst_23 {dimension_numbers = #tpu.dot_dimension_numbers<[1], [0], [0], [1], [0, 0, 1, 1], [], []>} : vector<8x64xbf16>, vector<64x128xbf16>, vector<8x128xf32> -> vector<8x128xf32>
    %c1_24 = arith.constant 1 : index
    %c0_25 = arith.constant 0 : index
    %c0_26 = arith.constant 0 : index
    %85 = vector.load %arg5[%c1_24, %c0_25, %c0_26] : memref<4x8x1xf32, #tpu.memory_space<vmem>>, vector<1x8x1xf32>
    %86 = vector.shape_cast %85 : vector<1x8x1xf32> to vector<8x1xf32>
    %87 = vector.broadcast %86 : vector<8x1xf32> to vector<8x128xf32>
    %88 = arith.addf %84, %87 : vector<8x128xf32>
    %89 = vector.extract_strided_slice %88 {offsets = [0, 0], sizes = [4, 128], strides = [1, 1]} : vector<8x128xf32> to vector<4x128xf32>
    %90 = math.tanh %89 : vector<4x128xf32>
    %91 = vector.extract_strided_slice %88 {offsets = [4, 0], sizes = [4, 128], strides = [1, 1]} : vector<8x128xf32> to vector<4x128xf32>
    %92 = math.exp %90 : vector<4x128xf32>
    %93 = arith.mulf %1, %92 : vector<4x128xf32>
    %94 = arith.addf %93, %91 : vector<4x128xf32>
    %cst_27 = arith.constant dense<0.000000e+00> : vector<128xf32>
    %95 = vector.multi_reduction <add>, %90, %cst_27 [0] : vector<4x128xf32> to vector<128xf32>
    %96 = vector.shape_cast %95 : vector<128xf32> to vector<1x128xf32>
    %97 = arith.addf %50, %96 : vector<1x128xf32>
    %c2 = arith.constant 2 : index
    %c0_28 = arith.constant 0 : index
    %c0_29 = arith.constant 0 : index
    %98 = vector.load %arg2[%c2, %c0_28, %c0_29] : memref<4x64x4xf32, #tpu.memory_space<vmem>>, vector<1x64x4xf32>
    %99 = vector.shape_cast %98 : vector<1x64x4xf32> to vector<64x4xf32>
    %c2_30 = arith.constant 2 : index
    %c0_31 = arith.constant 0 : index
    %c0_32 = arith.constant 0 : index
    %100 = vector.load %arg3[%c2_30, %c0_31, %c0_32] : memref<4x64x1xf32, #tpu.memory_space<vmem>>, vector<1x64x1xf32>
    %101 = vector.shape_cast %100 : vector<1x64x1xf32> to vector<64x1xf32>
    %102 = vector.extract_strided_slice %99 {offsets = [0, 0], sizes = [64, 1], strides = [1, 1]} : vector<64x4xf32> to vector<64x1xf32>
    %103 = vector.extract_strided_slice %94 {offsets = [0, 0], sizes = [1, 128], strides = [1, 1]} : vector<4x128xf32> to vector<1x128xf32>
    %104 = vector.broadcast %102 : vector<64x1xf32> to vector<64x128xf32>
    %105 = vector.broadcast %103 : vector<1x128xf32> to vector<64x128xf32>
    %106 = arith.mulf %104, %105 : vector<64x128xf32>
    %107 = vector.broadcast %101 : vector<64x1xf32> to vector<64x128xf32>
    %108 = arith.addf %107, %106 : vector<64x128xf32>
    %109 = vector.extract_strided_slice %99 {offsets = [0, 1], sizes = [64, 1], strides = [1, 1]} : vector<64x4xf32> to vector<64x1xf32>
    %110 = vector.extract_strided_slice %94 {offsets = [1, 0], sizes = [1, 128], strides = [1, 1]} : vector<4x128xf32> to vector<1x128xf32>
    %111 = vector.broadcast %109 : vector<64x1xf32> to vector<64x128xf32>
    %112 = vector.broadcast %110 : vector<1x128xf32> to vector<64x128xf32>
    %113 = arith.mulf %111, %112 : vector<64x128xf32>
    %114 = arith.addf %108, %113 : vector<64x128xf32>
    %115 = vector.extract_strided_slice %99 {offsets = [0, 2], sizes = [64, 1], strides = [1, 1]} : vector<64x4xf32> to vector<64x1xf32>
    %116 = vector.extract_strided_slice %94 {offsets = [2, 0], sizes = [1, 128], strides = [1, 1]} : vector<4x128xf32> to vector<1x128xf32>
    %117 = vector.broadcast %115 : vector<64x1xf32> to vector<64x128xf32>
    %118 = vector.broadcast %116 : vector<1x128xf32> to vector<64x128xf32>
    %119 = arith.mulf %117, %118 : vector<64x128xf32>
    %120 = arith.addf %114, %119 : vector<64x128xf32>
    %121 = vector.extract_strided_slice %99 {offsets = [0, 3], sizes = [64, 1], strides = [1, 1]} : vector<64x4xf32> to vector<64x1xf32>
    %122 = vector.extract_strided_slice %94 {offsets = [3, 0], sizes = [1, 128], strides = [1, 1]} : vector<4x128xf32> to vector<1x128xf32>
    %123 = vector.broadcast %121 : vector<64x1xf32> to vector<64x128xf32>
    %124 = vector.broadcast %122 : vector<1x128xf32> to vector<64x128xf32>
    %125 = arith.mulf %123, %124 : vector<64x128xf32>
    %126 = arith.addf %120, %125 : vector<64x128xf32>
    %127 = arith.truncf %126 : vector<64x128xf32> to vector<64x128xbf16>
    %128 = math.tanh %127 : vector<64x128xbf16>
    %c2_33 = arith.constant 2 : index
    %c0_34 = arith.constant 0 : index
    %c0_35 = arith.constant 0 : index
    %129 = vector.load %arg4[%c2_33, %c0_34, %c0_35] : memref<4x8x64xbf16, #tpu.memory_space<vmem>>, vector<1x8x64xbf16>
    %130 = vector.shape_cast %129 : vector<1x8x64xbf16> to vector<8x64xbf16>
    %cst_36 = arith.constant dense<0.000000e+00> : vector<8x128xf32>
    %131 = tpu.matmul %130, %128, %cst_36 {dimension_numbers = #tpu.dot_dimension_numbers<[1], [0], [0], [1], [0, 0, 1, 1], [], []>} : vector<8x64xbf16>, vector<64x128xbf16>, vector<8x128xf32> -> vector<8x128xf32>
    %c2_37 = arith.constant 2 : index
    %c0_38 = arith.constant 0 : index
    %c0_39 = arith.constant 0 : index
    %132 = vector.load %arg5[%c2_37, %c0_38, %c0_39] : memref<4x8x1xf32, #tpu.memory_space<vmem>>, vector<1x8x1xf32>
    %133 = vector.shape_cast %132 : vector<1x8x1xf32> to vector<8x1xf32>
    %134 = vector.broadcast %133 : vector<8x1xf32> to vector<8x128xf32>
    %135 = arith.addf %131, %134 : vector<8x128xf32>
    %136 = vector.extract_strided_slice %135 {offsets = [0, 0], sizes = [4, 128], strides = [1, 1]} : vector<8x128xf32> to vector<4x128xf32>
    %137 = math.tanh %136 : vector<4x128xf32>
    %138 = vector.extract_strided_slice %135 {offsets = [4, 0], sizes = [4, 128], strides = [1, 1]} : vector<8x128xf32> to vector<4x128xf32>
    %139 = math.exp %137 : vector<4x128xf32>
    %140 = arith.mulf %47, %139 : vector<4x128xf32>
    %141 = arith.addf %140, %138 : vector<4x128xf32>
    %cst_40 = arith.constant dense<0.000000e+00> : vector<128xf32>
    %142 = vector.multi_reduction <add>, %137, %cst_40 [0] : vector<4x128xf32> to vector<128xf32>
    %143 = vector.shape_cast %142 : vector<128xf32> to vector<1x128xf32>
    %144 = arith.addf %97, %143 : vector<1x128xf32>
    %c3 = arith.constant 3 : index
    %c0_41 = arith.constant 0 : index
    %c0_42 = arith.constant 0 : index
    %145 = vector.load %arg2[%c3, %c0_41, %c0_42] : memref<4x64x4xf32, #tpu.memory_space<vmem>>, vector<1x64x4xf32>
    %146 = vector.shape_cast %145 : vector<1x64x4xf32> to vector<64x4xf32>
    %c3_43 = arith.constant 3 : index
    %c0_44 = arith.constant 0 : index
    %c0_45 = arith.constant 0 : index
    %147 = vector.load %arg3[%c3_43, %c0_44, %c0_45] : memref<4x64x1xf32, #tpu.memory_space<vmem>>, vector<1x64x1xf32>
    %148 = vector.shape_cast %147 : vector<1x64x1xf32> to vector<64x1xf32>
    %149 = vector.extract_strided_slice %146 {offsets = [0, 0], sizes = [64, 1], strides = [1, 1]} : vector<64x4xf32> to vector<64x1xf32>
    %150 = vector.extract_strided_slice %141 {offsets = [0, 0], sizes = [1, 128], strides = [1, 1]} : vector<4x128xf32> to vector<1x128xf32>
    %151 = vector.broadcast %149 : vector<64x1xf32> to vector<64x128xf32>
    %152 = vector.broadcast %150 : vector<1x128xf32> to vector<64x128xf32>
    %153 = arith.mulf %151, %152 : vector<64x128xf32>
    %154 = vector.broadcast %148 : vector<64x1xf32> to vector<64x128xf32>
    %155 = arith.addf %154, %153 : vector<64x128xf32>
    %156 = vector.extract_strided_slice %146 {offsets = [0, 1], sizes = [64, 1], strides = [1, 1]} : vector<64x4xf32> to vector<64x1xf32>
    %157 = vector.extract_strided_slice %141 {offsets = [1, 0], sizes = [1, 128], strides = [1, 1]} : vector<4x128xf32> to vector<1x128xf32>
    %158 = vector.broadcast %156 : vector<64x1xf32> to vector<64x128xf32>
    %159 = vector.broadcast %157 : vector<1x128xf32> to vector<64x128xf32>
    %160 = arith.mulf %158, %159 : vector<64x128xf32>
    %161 = arith.addf %155, %160 : vector<64x128xf32>
    %162 = vector.extract_strided_slice %146 {offsets = [0, 2], sizes = [64, 1], strides = [1, 1]} : vector<64x4xf32> to vector<64x1xf32>
    %163 = vector.extract_strided_slice %141 {offsets = [2, 0], sizes = [1, 128], strides = [1, 1]} : vector<4x128xf32> to vector<1x128xf32>
    %164 = vector.broadcast %162 : vector<64x1xf32> to vector<64x128xf32>
    %165 = vector.broadcast %163 : vector<1x128xf32> to vector<64x128xf32>
    %166 = arith.mulf %164, %165 : vector<64x128xf32>
    %167 = arith.addf %161, %166 : vector<64x128xf32>
    %168 = vector.extract_strided_slice %146 {offsets = [0, 3], sizes = [64, 1], strides = [1, 1]} : vector<64x4xf32> to vector<64x1xf32>
    %169 = vector.extract_strided_slice %141 {offsets = [3, 0], sizes = [1, 128], strides = [1, 1]} : vector<4x128xf32> to vector<1x128xf32>
    %170 = vector.broadcast %168 : vector<64x1xf32> to vector<64x128xf32>
    %171 = vector.broadcast %169 : vector<1x128xf32> to vector<64x128xf32>
    %172 = arith.mulf %170, %171 : vector<64x128xf32>
    %173 = arith.addf %167, %172 : vector<64x128xf32>
    %174 = arith.truncf %173 : vector<64x128xf32> to vector<64x128xbf16>
    %175 = math.tanh %174 : vector<64x128xbf16>
    %c3_46 = arith.constant 3 : index
    %c0_47 = arith.constant 0 : index
    %c0_48 = arith.constant 0 : index
    %176 = vector.load %arg4[%c3_46, %c0_47, %c0_48] : memref<4x8x64xbf16, #tpu.memory_space<vmem>>, vector<1x8x64xbf16>
    %177 = vector.shape_cast %176 : vector<1x8x64xbf16> to vector<8x64xbf16>
    %cst_49 = arith.constant dense<0.000000e+00> : vector<8x128xf32>
    %178 = tpu.matmul %177, %175, %cst_49 {dimension_numbers = #tpu.dot_dimension_numbers<[1], [0], [0], [1], [0, 0, 1, 1], [], []>} : vector<8x64xbf16>, vector<64x128xbf16>, vector<8x128xf32> -> vector<8x128xf32>
    %c3_50 = arith.constant 3 : index
    %c0_51 = arith.constant 0 : index
    %c0_52 = arith.constant 0 : index
    %179 = vector.load %arg5[%c3_50, %c0_51, %c0_52] : memref<4x8x1xf32, #tpu.memory_space<vmem>>, vector<1x8x1xf32>
    %180 = vector.shape_cast %179 : vector<1x8x1xf32> to vector<8x1xf32>
    %181 = vector.broadcast %180 : vector<8x1xf32> to vector<8x128xf32>
    %182 = arith.addf %178, %181 : vector<8x128xf32>
    %183 = vector.extract_strided_slice %182 {offsets = [0, 0], sizes = [4, 128], strides = [1, 1]} : vector<8x128xf32> to vector<4x128xf32>
    %184 = math.tanh %183 : vector<4x128xf32>
    %185 = vector.extract_strided_slice %182 {offsets = [4, 0], sizes = [4, 128], strides = [1, 1]} : vector<8x128xf32> to vector<4x128xf32>
    %186 = math.exp %184 : vector<4x128xf32>
    %187 = arith.mulf %94, %186 : vector<4x128xf32>
    %188 = arith.addf %187, %185 : vector<4x128xf32>
    %cst_53 = arith.constant dense<0.000000e+00> : vector<128xf32>
    %189 = vector.multi_reduction <add>, %184, %cst_53 [0] : vector<4x128xf32> to vector<128xf32>
    %190 = vector.shape_cast %189 : vector<128xf32> to vector<1x128xf32>
    %191 = arith.addf %144, %190 : vector<1x128xf32>
    %c0_54 = arith.constant 0 : index
    %c0_55 = arith.constant 0 : index
    %192 = vector.load %arg6[%c0_54, %c0_55] : memref<8x128xf32, #tpu.memory_space<vmem>>, vector<4x128xf32>
    tpu.vector_store %arg6[%c0_54, %c0_55], %188 {strides = array<i32>} : memref<8x128xf32, #tpu.memory_space<vmem>>, vector<4x128xf32>,
    %c4 = arith.constant 4 : index
    %c0_56 = arith.constant 0 : index
    %193 = vector.load %arg6[%c4, %c0_56] : memref<8x128xf32, #tpu.memory_space<vmem>>, vector<4x128xf32>
    tpu.vector_store %arg6[%c4, %c0_56], %141 {strides = array<i32>} : memref<8x128xf32, #tpu.memory_space<vmem>>, vector<4x128xf32>,
    %194 = arith.mulf %188, %188 : vector<4x128xf32>
    %cst_57 = arith.constant dense<0.000000e+00> : vector<128xf32>
    %195 = vector.multi_reduction <add>, %194, %cst_57 [0] : vector<4x128xf32> to vector<128xf32>
    %196 = vector.shape_cast %195 : vector<128xf32> to vector<1x128xf32>
    %197 = arith.mulf %141, %141 : vector<4x128xf32>
    %cst_58 = arith.constant dense<0.000000e+00> : vector<128xf32>
    %198 = vector.multi_reduction <add>, %197, %cst_58 [0] : vector<4x128xf32> to vector<128xf32>
    %199 = vector.shape_cast %198 : vector<128xf32> to vector<1x128xf32>
    %200 = arith.addf %196, %199 : vector<1x128xf32>
    %cst_59 = arith.constant -5.000000e-01 : f32
    %201 = vector.broadcast %cst_59 : f32 to vector<1x128xf32>
    %202 = arith.mulf %201, %200 : vector<1x128xf32>
    %cst_60 = arith.constant 7.35150814 : f32
    %203 = vector.broadcast %cst_60 : f32 to vector<1x128xf32>
    %204 = arith.subf %202, %203 : vector<1x128xf32>
    %c0_61 = arith.constant 0 : index
    %c0_62 = arith.constant 0 : index
    %205 = vector.load %arg7[%c0_61, %c0_62] : memref<2x128xf32, #tpu.memory_space<vmem>>, vector<1x128xf32>
    tpu.vector_store %arg7[%c0_61, %c0_62], %204 {strides = array<i32>} : memref<2x128xf32, #tpu.memory_space<vmem>>, vector<1x128xf32>,
    %c1_63 = arith.constant 1 : index
    %c0_64 = arith.constant 0 : index
    %206 = vector.load %arg7[%c1_63, %c0_64] : memref<2x128xf32, #tpu.memory_space<vmem>>, vector<1x128xf32>
    tpu.vector_store %arg7[%c1_63, %c0_64], %191 {strides = array<i32>} : memref<2x128xf32, #tpu.memory_space<vmem>>, vector<1x128xf32>,
    return
  }
  func.func @transform_0(%arg0: i32) -> (i32, i32) {
    %c0_i32 = arith.constant 0 : i32
    %c0_i32_0 = arith.constant 0 : i32
    return %c0_i32, %arg0 : i32, i32
  }
  func.func @transform_1(%arg0: i32) -> (i32, i32, i32) {
    %c0_i32 = arith.constant 0 : i32
    %c0_i32_0 = arith.constant 0 : i32
    %c0_i32_1 = arith.constant 0 : i32
    %c0_i32_2 = arith.constant 0 : i32
    return %c0_i32, %c0_i32_0, %c0_i32_1 : i32, i32, i32
  }
  func.func @transform_2(%arg0: i32) -> (i32, i32, i32) {
    %c0_i32 = arith.constant 0 : i32
    %c0_i32_0 = arith.constant 0 : i32
    %c0_i32_1 = arith.constant 0 : i32
    %c0_i32_2 = arith.constant 0 : i32
    return %c0_i32, %c0_i32_0, %c0_i32_1 : i32, i32, i32
  }
  func.func @transform_3(%arg0: i32) -> (i32, i32, i32) {
    %c0_i32 = arith.constant 0 : i32
    %c0_i32_0 = arith.constant 0 : i32
    %c0_i32_1 = arith.constant 0 : i32
    %c0_i32_2 = arith.constant 0 : i32
    return %c0_i32, %c0_i32_0, %c0_i32_1 : i32, i32, i32
  }
  func.func @transform_4(%arg0: i32) -> (i32, i32, i32) {
    %c0_i32 = arith.constant 0 : i32
    %c0_i32_0 = arith.constant 0 : i32
    %c0_i32_1 = arith.constant 0 : i32
    %c0_i32_2 = arith.constant 0 : i32
    return %c0_i32, %c0_i32_0, %c0_i32_1 : i32, i32, i32
  }
  func.func @transform_5(%arg0: i32) -> (i32, i32) {
    %c0_i32 = arith.constant 0 : i32
    %c0_i32_0 = arith.constant 0 : i32
    return %c0_i32, %arg0 : i32, i32
  }
  func.func @transform_6(%arg0: i32) -> (i32, i32) {
    %c0_i32 = arith.constant 0 : i32
    %c0_i32_0 = arith.constant 0 : i32
    return %c0_i32, %arg0 : i32, i32
  }
}

</mosaic_0001>

<bundles_post_ra>
// kernel: normalizing_flow_forward.1
= control target key start
LH: loop header
LB: loop body
LE: loop exit
PB: predicated region body
PF: predicated region fallthrough
CT: control target
= control target key end

     0   :  { %v1731_v0 = vmov 2   ;;  %v1732_v1 = vmov 0   ;;  %v1733_v7 = vmov 1   ;;  %v1734_v14 = vmov 3   ;;  %s2648_s2 = inlined_call_operand.vmem [shape: f32[4,64,1], index: 2, kind: input, shape index: {}]   ;;  %s2649_s1 = inlined_call_operand.vmem [shape: f32[4,64,4], index: 1, kind: input, shape index: {}]   ;;  %s2650_s4 = inlined_call_operand.vmem [shape: f32[4,8,1], index: 4, kind: input, shape index: {}]   ;;  %s2651_s0 = inlined_call_operand.vmem [shape: f32[8,128], index: 0, kind: input, shape index: {}]   ;;  %s2652_s3 = inlined_call_operand.vmem [shape: bf16[4,8,64], index: 3, kind: input, shape index: {}]   ;;  %s2653_s5 = inlined_call_operand.vmem [shape: f32[8,128], index: 5, kind: output, shape index: {0}]   ;;  %s2654_s6 = inlined_call_operand.vmem [shape: f32[2,128], index: 6, kind: output, shape index: {1}]  }
   0x1   :  { %1597 = vset.pattern.permute.xlu0 %v1731_v0  ;;  %1589 = vset.pattern.permute.xlu1 %v1732_v1  ;;  %v38_v2 = vld [vmem:[%s2648_s2 + $0x30] sm:$0xff]  ;;  %v28_v3 = vld [vmem:[%s2649_s1 + $0x20] sm:$0xff]  ;;  %v39_v4 = vld [vmem:[%s2648_s2 + $0x38] sm:$0xff]  ;;  %v1735_v19 = vmov 0.0   ;;  %vm1736_vm0 = vmmov 0   ;;  %v80_v37 = vlaneseq  ;;  %vm311_vm1 = vcmask 523264  }
   0x2   :  { %124 = vperm.xlu1 %1589, %v38_v2   ;;  %209 = vperm.xlu0 %1597, %v28_v3   ;;  %v30_v5 = vld [vmem:[%s2649_s1 + $0x30] sm:$0xff]  ;;  %v31_v6 = vld [vmem:[%s2649_s1 + $0x38] sm:$0xff]  ;;  %v29_v8 = vld [vmem:[%s2649_s1 + $0x28] sm:$0xff]  ;;  %vm363_vm2 = vcmask 1043456  }
   0x3   :  { %v36_v9 = vld [vmem:[%s2648_s2 + $0x20] sm:$0xff]  ;;  %v35_v10 = vld [vmem:[%s2648_s2 + $0x18] sm:$0xff]  ;;  %v25_v11 = vld [vmem:[%s2649_s1 + $0x8] sm:$0xff]  ;;  %1535 = vmatprep.subr.bf16.mxu0 %v1735_v19  ;;  %1547 = vmatprep.subr.bf16.mxu1 %v1735_v19  ;;  %v1900_v40 = vshrl.u32 %v80_v37, 7 }
   0x4   :  { %v37_v12 = vld [vmem:[%s2648_s2 + $0x28] sm:$0xff]  ;;  %v32_v13 = vld [vmem:[%s2648_s2] sm:$0xff]  ;;  %v26_v16 = vld [vmem:[%s2649_s1 + $0x10] sm:$0xff]  ;;  %1543 = vmatprep.mubr.msk.bf16.mxu0 %vm1736_vm0, %v1735_v19  ;;  %1555 = vmatprep.mubr.msk.bf16.mxu1 %vm1736_vm0, %v1735_v19 }
   0x5   :  { %v24_v15 = vld [vmem:[%s2649_s1] sm:$0xff]  ;;  %v27_v17 = vld [vmem:[%s2649_s1 + $0x18] sm:$0xff]  ;;  %v34_v18 = vld [vmem:[%s2648_s2 + $0x10] sm:$0xff]  ;;  %v82_v44 = vsub.s32 0, %v1900_v40  ;;  %v174_v51 = vsub.s32 1, %v1900_v40  ;;  %v226_v55 = vsub.s32 2, %v1900_v40 }
   0x6   :  { %129 = vperm.xlu1 %1589, %v39_v4   ;;  %1598 = vset.pattern.permute.xlu0 %v1732_v1  ;;  %v33_v20 = vld [vmem:[%s2648_s2 + $0x8] sm:$0xff]  ;;  %v1849_v21 = vld [vmem:[%s2649_s1 + $0x70] sm:$0xff]  ;;  %v1856_v22 = vld [vmem:[%s2649_s1 + $0x78] sm:$0xff]  ;;  %v278_v60 = vsub.s32 3, %v1900_v40 }
   0x7   :  { %72 = vperm.xlu0 %1598, %v30_v5   ;;  %v1472_v27 = vld [vmem:[%s2648_s2 + $0x78] sm:$0xff]  ;;  %v1877_v30 = vld [vmem:[%s2649_s1 + $0x60] sm:$0xff]  ;;  %v1471_v35 = vld [vmem:[%s2648_s2 + $0x70] sm:$0xff] }
   0x8   :  { %v305_v33 = vld [vmem:[%s2650_s4] sm:$0xff]  ;;  %v1906_v41 = vld [vmem:[%s2649_s1 + $0x68] sm:$0xff]  ;;  %v1468_v49 = vld [vmem:[%s2648_s2 + $0x58] sm:$0xff] }
   0x9   :  { %v1469_v43 = vld [vmem:[%s2648_s2 + $0x60] sm:$0xff]  ;;  %v1470_v48 = vld [vmem:[%s2648_s2 + $0x68] sm:$0xff] }
   0xa   :  { %1590 = vset.pattern.permute.xlu1 %v1733_v7  ;;  %v1921_v46 = vld [vmem:[%s2651_s0] sm:$0xff]  ;;  %v1943_v54 = vld [vmem:[%s2649_s1 + $0x48] sm:$0xff] }
   0xb   :  { %169 = vperm.xlu1 %1590, %v31_v6   ;;  %77 = vperm.xlu0 %1598, %v31_v6   ;;  %v1934_v50 = vrot.slane %v1921_v46, %v82_v44  ;;  %v1950_v57 = vrot.slane %v1921_v46, %v174_v51  ;;  %v1465_v63 = vld [vmem:[%s2648_s2 + $0x40] sm:$0xff]  ;;  %v1964_v2 = vrot.slane %v1921_v46, %v226_v55 }
   0xf   :  { %1591 = vset.pattern.permute.xlu1 %v1732_v1  ;;  %67 = vperm.xlu0 %1598, %v29_v8  }
  0x10   :  { %62 = vperm.xlu1 %1591, %v28_v3  }
  0x13   :  { %114 = vperm.xlu0 %1598, %v36_v9  }
  0x14   :  { %1592 = vset.pattern.permute.xlu1 %v1731_v0 }
  0x15   :  { %217 = vperm.xlu1 %1592, %v30_v5  }
  0x17   :  { %109 = vperm.xlu0 %1598, %v35_v10  }
  0x19   :  { %221 = vperm.xlu1 %1592, %v31_v6  }
  0x1b   :  { %47 = vperm.xlu0 %1598, %v25_v11  }
  0x1d   :  { %1593 = vset.pattern.permute.xlu1 %v1732_v1 }
  0x1e   :  { %119 = vperm.xlu1 %1593, %v37_v12  }
  0x1f   :  { %94 = vperm.xlu0 %1598, %v32_v13   ;;  %v1986_v13 = vld [vmem:[%s2649_s1 + $0x50] sm:$0xff] }
  0x22   :  { %1594 = vset.pattern.permute.xlu1 %v1733_v7 }
  0x23   :  { %161 = vperm.xlu1 %1594, %v29_v8   ;;  %1605 = vset.pattern.permute.xlu0 %v1733_v7 }
  0x24   :  { %165 = vperm.xlu0 %1605, %v30_v5  }
  0x27   :  { %1595 = vset.pattern.permute.xlu1 %v1734_v14 }
  0x28   :  { %269 = vperm.xlu1 %1595, %v30_v5   ;;  %157 = vperm.xlu0 %1605, %v28_v3  }
  0x2c   :  { %1596 = vset.pattern.permute.xlu1 %v1732_v1  ;;  %141 = vperm.xlu0 %1605, %v24_v15  }
  0x2d   :  { %52 = vperm.xlu1 %1596, %v26_v16  }
  0x30   :  { %1607 = vset.pattern.permute.xlu0 %v1734_v14 }
  0x31   :  { %57 = vperm.xlu1 %1596, %v27_v17   ;;  %273 = vperm.xlu0 %1607, %v31_v6   ;;  %v1971_v6 = vrot.slane %v1921_v46, %v278_v60 }
  0x35   :  { %1599 = vset.pattern.permute.xlu1 %v1731_v0  ;;  %261 = vperm.xlu0 %1607, %v28_v3  }
  0x36   :  { %213 = vperm.xlu1 %1599, %v29_v8  }
  0x39   :  { %257 = vperm.xlu0 %1607, %v27_v17  }
  0x3a   :  { %1600 = vset.pattern.permute.xlu1 %v1732_v1 }
  0x3b   :  { %104 = vperm.xlu1 %1600, %v34_v18  }
  0x3d   :  { %245 = vperm.xlu0 %1607, %v24_v15  }
  0x3f   :  { %1601 = vset.pattern.permute.xlu1 %v1733_v7 }
  0x40   :  { %149 = vperm.xlu1 %1601, %v26_v16  }
  0x41   :  { %1620 = vset.pattern.permute.xlu0 %v1731_v0 }
  0x42   :  { %559 = vperm.xlu0 %1620, %v1877_v30  }
  0x44   :  { %153 = vperm.xlu1 %1601, %v27_v17  }
  0x46   :  { %1621 = vset.pattern.permute.xlu0 %v1732_v1 }
  0x47   :  { %308 = vperm.xlu0 %1621, %v305_v33   ;;  %v2003_v33 = vld [vmem:[%s2649_s1 + $0x40] sm:$0xff] }
  0x48   :  { %1602 = vset.pattern.permute.xlu1 %v1734_v14 }
  0x49   :  { %265 = vperm.xlu1 %1602, %v29_v8  }
  0x4b   :  { %474 = vperm.xlu0 %1621, %v1471_v35  }
  0x4d   :  { %1603 = vset.pattern.permute.xlu1 %v1732_v1 }
  0x4e   :  { %42 = vperm.xlu1 %1603, %v24_v15  }
  0x4f   :  { %417 = vperm.xlu0 %1621, %v1906_v41  }
  0x52   :  { %1604 = vset.pattern.permute.xlu1 %v1731_v0 }
  0x53   :  { %201 = vperm.xlu1 %1604, %v26_v16   ;;  %464 = vperm.xlu0 %1621, %v1469_v43  }
  0x57   :  { %205 = vperm.xlu1 %1604, %v27_v17   ;;  %459 = vperm.xlu0 %1621, %v1468_v49  }
  0x5b   :  { %1606 = vset.pattern.permute.xlu1 %v1732_v1  ;;  %397 = vperm.xlu0 %1621, %v1943_v54  }
  0x5c   :  { %99 = vperm.xlu1 %1606, %v33_v20  }
  0x5f   :  { %444 = vperm.xlu0 %1621, %v1465_v63  }
  0x60   :  { %1608 = vset.pattern.permute.xlu1 %v1733_v7 }
  0x61   :  { %145 = vperm.xlu1 %1608, %v25_v11  }
  0x63   :  { %1628 = vset.pattern.permute.xlu0 %v1733_v7 }
  0x64   :  { %515 = vperm.xlu0 %1628, %v1849_v21  }
  0x65   :  { %1609 = vset.pattern.permute.xlu1 %v1734_v14 }
  0x66   :  { %253 = vperm.xlu1 %1609, %v26_v16  }
  0x68   :  { %507 = vperm.xlu0 %1628, %v1877_v30  }
  0x6a   :  { %1610 = vset.pattern.permute.xlu1 %v1731_v0 }
  0x6b   :  { %193 = vperm.xlu1 %1610, %v24_v15  }
  0x6c   :  { %491 = vperm.xlu0 %1628, %v2003_v33  }
  0x6f   :  { %197 = vperm.xlu1 %1610, %v25_v11  }
  0x70   :  { %1630 = vset.pattern.permute.xlu0 %v1734_v14 }
  0x71   :  { %623 = vperm.xlu0 %1630, %v1856_v22  }
  0x73   :  { %1611 = vset.pattern.permute.xlu1 %v1734_v14 }
  0x74   :  { %249 = vperm.xlu1 %1611, %v25_v11  }
  0x75   :  { %611 = vperm.xlu0 %1630, %v1877_v30  }
  0x78   :  { %1612 = vset.pattern.permute.xlu1 %v1732_v1 }
  0x79   :  { %422 = vperm.xlu1 %1612, %v1849_v21  }
  0x7d   :  { %v1858_v23 = vpop.permute.xlu1 %124  ;;  %v1860_v24 = vpop.permute.xlu0 %209  ;;  %427 = vperm.xlu1 %1612, %v1856_v22  }
  0x81   :  { %v1863_v25 = vpop.permute.xlu1 %129  ;;  %479 = vperm.xlu1 %1612, %v1472_v27  }
  0x82   :  { %v73_v26 = vpop.permute.xlu0 %72 }
  0x83   :  { %v90_v56 = vmul.f32 %v1934_v50, %v73_v26  ;;  %v1460_v26 = vld [vmem:[%s2649_s1 + $0x58] sm:$0xff] }
  0x84   :  { %607 = vperm.xlu0 %1630, %v1460_v26  }
  0x85   :  { %1613 = vset.pattern.permute.xlu1 %v1733_v7  ;;  %v138_v3 = vadd.f32 %v1858_v23, %v90_v56 }
  0x86   :  { %v1868_v28 = vpop.permute.xlu1 %169  ;;  %v78_v29 = vpop.permute.xlu0 %77  ;;  %519 = vperm.xlu1 %1613, %v1856_v22  }
  0x87   :  { %v91_v58 = vmul.f32 %v1934_v50, %v78_v29  ;;  %v183_v10 = vmul.f32 %v1950_v57, %v1868_v28 }
  0x88   :  { %595 = vperm.xlu0 %1630, %v2003_v33  }
  0x89   :  { %v139_v4 = vadd.f32 %v1863_v25, %v91_v58 }
  0x8a   :  { %v1880_v31 = vpop.permute.xlu0 %67  ;;  %1614 = vset.pattern.permute.xlu1 %v1732_v1 }
  0x8b   :  { %v1883_v32 = vpop.permute.xlu1 %62  ;;  %412 = vperm.xlu1 %1614, %v1877_v30   ;;  %v191_v15 = vadd.f32 %v183_v10, %v139_v4  ;;  %v89_v43 = vmul.f32 %v1934_v50, %v1880_v31  ;;  %v232_v30 = vmul.f32 %v1964_v2, %v1860_v24 }
  0x8c   :  { %v88_v37 = vmul.f32 %v1934_v50, %v1883_v32  ;;  %1643 = vset.pattern.permute.xlu0 %v1731_v0 }
  0x8e   :  { %v1890_v34 = vpop.permute.xlu0 %114 }
  0x8f   :  { %1615 = vset.pattern.permute.xlu1 %v1731_v0  ;;  %v136_v49 = vadd.f32 %v1890_v34, %v88_v37 }
  0x90   :  { %v218_v36 = vpop.permute.xlu1 %217  ;;  %567 = vperm.xlu1 %1615, %v1849_v21  }
  0x91   :  { %v234_v11 = vmul.f32 %v1964_v2, %v218_v36  ;;  %v1467_v36 = vld [vmem:[%s2648_s2 + $0x50] sm:$0xff] }
  0x92   :  { %v1897_v38 = vpop.permute.xlu0 %109 }
  0x94   :  { %v222_v39 = vpop.permute.xlu1 %221  ;;  %571 = vperm.xlu1 %1615, %v1856_v22  }
  0x95   :  { %v235_v12 = vmul.f32 %v1964_v2, %v222_v39 }
  0x96   :  { %v1908_v42 = vpop.permute.xlu0 %47 }
  0x97   :  { %v243_v23 = vadd.f32 %v235_v12, %v191_v15 }
  0x98   :  { %1616 = vset.pattern.permute.xlu1 %v1732_v1 }
  0x99   :  { %v1915_v45 = vpop.permute.xlu1 %119  ;;  %469 = vperm.xlu1 %1616, %v1470_v48  }
  0x9a   :  { %v1923_v47 = vpop.permute.xlu0 %94  ;;  %v137_v31 = vadd.f32 %v1915_v45, %v89_v43 }
  0x9d   :  { %1617 = vset.pattern.permute.xlu1 %v1733_v7 }
  0x9e   :  { %v1938_v52 = vpop.permute.xlu1 %161  ;;  %511 = vperm.xlu1 %1617, %v1906_v41  }
  0x9f   :  { %v166_v53 = vpop.permute.xlu0 %165 }
  0xa0   :  { %v182_v59 = vmul.f32 %v1950_v57, %v166_v53  ;;  %v181_v53 = vmul.f32 %v1950_v57, %v1938_v52 }
  0xa2   :  { %v190_v5 = vadd.f32 %v182_v59, %v138_v3  ;;  %1618 = vset.pattern.permute.xlu1 %v1734_v14  ;;  %v189_v34 = vadd.f32 %v181_v53, %v137_v31 }
  0xa3   :  { %v270_v61 = vpop.permute.xlu1 %269  ;;  %v158_v62 = vpop.permute.xlu0 %157  ;;  %619 = vperm.xlu1 %1618, %v1849_v21  }
  0xa4   :  { %v242_v16 = vadd.f32 %v234_v11, %v190_v5  ;;  %v286_v17 = vmul.f32 %v1971_v6, %v270_v61  ;;  %v180_v48 = vmul.f32 %v1950_v57, %v158_v62 }
  0xa6   :  { %v294_v27 = vadd.f32 %v286_v17, %v242_v16  ;;  %v188_v58 = vadd.f32 %v180_v48, %v136_v49 }
  0xa7   :  { %v1973_v8 = vpop.permute.xlu0 %141  ;;  %1619 = vset.pattern.permute.xlu1 %v1732_v1 }
  0xa8   :  { %v1976_v9 = vpop.permute.xlu1 %52  ;;  %402 = vperm.xlu1 %1619, %v1986_v13   ;;  %v240_v62 = vadd.f32 %v232_v30, %v188_v58  ;;  %v85_v30 = vmul.f32 %v1934_v50, %v1908_v42 }
  0xac   :  { %v1991_v18 = vpop.permute.xlu1 %57  ;;  %v274_v20 = vpop.permute.xlu0 %273  ;;  %407 = vperm.xlu1 %1619, %v1460_v26  }
  0xad   :  { %v287_v25 = vmul.f32 %v1971_v6, %v274_v20  ;;  %v87_v15 = vmul.f32 %v1934_v50, %v1991_v18  ;;  %v86_v20 = vmul.f32 %v1934_v50, %v1976_v9 }
  0xaf   :  { %v295_v28 = vadd.f32 %v287_v25, %v243_v23  ;;  %v135_v23 = vadd.f32 %v1897_v38, %v87_v15  ;;  %v1482_v15 = vld [vmem:[%s2649_s1 + $0xb0] sm:$0xff] }
  0xb0   :  { %1622 = vset.pattern.permute.xlu1 %v1731_v0  ;;  %v262_v56 = vpop.permute.xlu0 %261 }
  0xb1   :  { %v299_v29 = vpack.c.bf16 %v295_v28, %v294_v27  ;;  %v214_v21 = vpop.permute.xlu1 %213  ;;  %563 = vperm.xlu1 %1622, %v1906_v41   ;;  %v284_v52 = vmul.f32 %v1971_v6, %v262_v56  ;;  %v176_v56 = vmul.f32 %v1950_v57, %v1973_v8 }
  0xb2   :  { %v233_v59 = vmul.f32 %v1964_v2, %v214_v21 }
  0xb3   :  { %1682 = vtanh.bf16 %v299_v29  ;;  %v292_v24 = vadd.f32 %v284_v52, %v240_v62 }
  0xb4   :  { %v241_v63 = vadd.f32 %v233_v59, %v189_v34  ;;  %v258_v27 = vpop.permute.xlu0 %257 }
  0xb5   :  { %1623 = vset.pattern.permute.xlu1 %v1732_v1  ;;  %v283_v43 = vmul.f32 %v1971_v6, %v258_v27  ;;  %v1490_v27 = vld [vmem:[%s2648_s2 + $0xb0] sm:$0xff] }
  0xb6   :  { %v2007_v35 = vpop.permute.xlu1 %104  ;;  %454 = vperm.xlu1 %1623, %v1467_v36  }
  0xb7   :  { %v134_v28 = vadd.f32 %v2007_v35, %v86_v20 }
  0xb8   :  { %v246_v8 = vpop.permute.xlu0 %245 }
  0xb9   :  { %v280_v42 = vmul.f32 %v1971_v6, %v246_v8  ;;  %v2201_v8 = vld [vmem:[%s2649_s1 + $0x80] sm:$0xff] }
  0xba   :  { %1624 = vset.pattern.permute.xlu1 %v1733_v7 }
  0xbb   :  { %v150_v39 = vpop.permute.xlu1 %149  ;;  %499 = vperm.xlu1 %1624, %v1986_v13  }
  0xbc   :  { %v178_v25 = vmul.f32 %v1950_v57, %v150_v39 }
  0xbe   :  { %v186_v36 = vadd.f32 %v178_v25, %v134_v28 }
  0xbf   :  { %v154_v22 = vpop.permute.xlu1 %153  ;;  %503 = vperm.xlu1 %1624, %v1460_v26  }
  0xc0   :  { %v179_v17 = vmul.f32 %v1950_v57, %v154_v22 }
  0xc1   :  { %v1683_v32 = vpop.eup %1682 }
  0xc2   :  { %1536 = vmatpush3.bf16.msra.mxu0 %v1683_v32  ;;  %v187_v29 = vadd.f32 %v179_v17, %v135_v23  ;;  %v1491_v17 = vld [vmem:[%s2648_s2 + $0xb8] sm:$0xff]  ;;  %v2123_v23 = vld [vmem:[%s2649_s1 + $0xa0] sm:$0xff] }
  0xc3   :  { %1537 = vmatprep.subr.bf16.mxu0 %v1735_v19  ;;  %1625 = vset.pattern.permute.xlu1 %v1734_v14 }
  0xc4   :  { %v266_v61 = vpop.permute.xlu1 %265  ;;  %615 = vperm.xlu1 %1625, %v1906_v41   ;;  %v1466_v41 = vld [vmem:[%s2648_s2 + $0x48] sm:$0xff]  ;;  %909 = vperm.xlu0 %1643, %v2123_v23  }
  0xc5   :  { %v285_v3 = vmul.f32 %v1971_v6, %v266_v61 }
  0xc7   :  { %v293_v4 = vadd.f32 %v285_v3, %v241_v63 }
  0xc8   :  { %1626 = vset.pattern.permute.xlu1 %v1732_v1  ;;  %1644 = vset.pattern.permute.xlu0 %v1732_v1 }
  0xc9   :  { %v298_v45 = vpack.c.bf16 %v293_v4, %v292_v24  ;;  %v43_v5 = vpop.permute.xlu1 %42  ;;  %392 = vperm.xlu1 %1626, %v2003_v33  }
  0xca   :  { %v84_v48 = vmul.f32 %v1934_v50, %v43_v5 }
  0xcb   :  { %1684 = vtanh.bf16 %v298_v45 }
  0xcc   :  { %v132_v32 = vadd.f32 %v1923_v47, %v84_v48 }
  0xcd   :  { %1627 = vset.pattern.permute.xlu1 %v1731_v0 }
  0xce   :  { %v202_v10 = vpop.permute.xlu1 %201  ;;  %551 = vperm.xlu1 %1627, %v1986_v13  }
  0xcf   :  { %v230_v21 = vmul.f32 %v1964_v2, %v202_v10 }
  0xd1   :  { %v238_v38 = vadd.f32 %v230_v21, %v186_v36  ;;  %v2149_v21 = vpop.permute.xlu0 %559  ;;  %v1488_v36 = vld [vmem:[%s2648_s2 + $0xa0] sm:$0xff] }
  0xd2   :  { %v206_v11 = vpop.permute.xlu1 %205  ;;  %555 = vperm.xlu1 %1627, %v1460_v26  }
  0xd3   :  { %v231_v18 = vmul.f32 %v1964_v2, %v206_v11 }
  0xd5   :  { %v239_v37 = vadd.f32 %v231_v18, %v187_v29  ;;  %v1474_v18 = vld [vmem:[%s2650_s4 + $0x8] sm:$0xff] }
  0xd6   :  { %1629 = vset.pattern.permute.xlu1 %v1732_v1  ;;  %660 = vperm.xlu0 %1644, %v1474_v18   ;;  %v2145_v29 = vld [vmem:[%s2649_s1 + $0xa8] sm:$0xff]  ;;  %v2658_v18 = vsub.s32 4, %v1900_v40 }
  0xd7   :  { %v100_v12 = vpop.permute.xlu1 %99  ;;  %449 = vperm.xlu1 %1629, %v1466_v41   ;;  %v291_v49 = vadd.f32 %v283_v43, %v239_v37  ;;  %v2110_v41 = vld [vmem:[%s2649_s1 + $0xb8] sm:$0xff]  ;;  %v1489_v37 = vld [vmem:[%s2648_s2 + $0xa8] sm:$0xff] }
  0xd8   :  { %v133_v34 = vadd.f32 %v100_v12, %v85_v30 }
  0xd9   :  { %v1685_v16 = vpop.eup %1684 }
  0xda   :  { %1538 = vmatpush3.bf16.msra.mxu0 %v1685_v16  ;;  %824 = vperm.xlu0 %1644, %v1490_v27  }
  0xdb   :  { %1539 = vmatprep.subr.bf16.mxu0 %v1735_v19  ;;  %1631 = vset.pattern.permute.xlu1 %v1733_v7 }
  0xdc   :  { %v146_v26 = vpop.permute.xlu1 %145  ;;  %495 = vperm.xlu1 %1631, %v1943_v54  }
  0xdd   :  { %v177_v31 = vmul.f32 %v1950_v57, %v146_v26 }
  0xde   :  { %767 = vperm.xlu0 %1644, %v2145_v29  }
  0xdf   :  { %v185_v61 = vadd.f32 %v177_v31, %v133_v34 }
  0xe0   :  { %1632 = vset.pattern.permute.xlu1 %v1734_v14 }
  0xe1   :  { %v254_v9 = vpop.permute.xlu1 %253  ;;  %603 = vperm.xlu1 %1632, %v1986_v13   ;;  %v184_v13 = vadd.f32 %v176_v56, %v132_v32  ;;  %v1479_v32 = vld [vmem:[%s2649_s1 + $0x98] sm:$0xff] }
  0xe2   :  { %v282_v39 = vmul.f32 %v1971_v6, %v254_v9  ;;  %814 = vperm.xlu0 %1644, %v1488_v36   ;;  %v1487_v9 = vld [vmem:[%s2648_s2 + $0x98] sm:$0xff] }
  0xe4   :  { %v290_v53 = vadd.f32 %v282_v39, %v238_v38  ;;  %v309_v38 = vpop.permute.xlu0 %308  ;;  %v2167_v39 = vld [vmem:[%s2649_s1 + $0x88] sm:$0xff] }
  0xe5   :  { %1633 = vset.pattern.permute.xlu1 %v1731_v0 }
  0xe6   :  { %v297_v35 = vpack.c.bf16 %v291_v49, %v290_v53  ;;  %v194_v22 = vpop.permute.xlu1 %193  ;;  %543 = vperm.xlu1 %1633, %v2003_v33   ;;  %809 = vperm.xlu0 %1644, %v1487_v9   ;;  %v1484_v53 = vld [vmem:[%s2648_s2 + $0x80] sm:$0xff] }
  0xe7   :  { %v228_v58 = vmul.f32 %v1964_v2, %v194_v22  ;;  %v2184_v22 = vld [vmem:[%s2649_s1 + $0x90] sm:$0xff] }
  0xe8   :  { %1686 = vtanh.bf16 %v297_v35  ;;  %v2173_v49 = vpop.permute.xlu0 %474 }
  0xe9   :  { %v236_v47 = vadd.f32 %v228_v58, %v184_v13 }
  0xea   :  { %v198_v59 = vpop.permute.xlu1 %197  ;;  %547 = vperm.xlu1 %1633, %v1943_v54   ;;  %747 = vperm.xlu0 %1644, %v2167_v39  }
  0xeb   :  { %v229_v52 = vmul.f32 %v1964_v2, %v198_v59  ;;  %v288_v63 = vadd.f32 %v280_v42, %v236_v47 }
  0xec   :  { %v418_v56 = vpop.permute.xlu0 %417 }
  0xed   :  { %v237_v50 = vadd.f32 %v229_v52, %v185_v61 }
  0xee   :  { %1634 = vset.pattern.permute.xlu1 %v1734_v14  ;;  %794 = vperm.xlu0 %1644, %v1484_v53   ;;  %v2656_v53 = vsub.s32 6, %v1900_v40 }
  0xef   :  { %v250_v62 = vpop.permute.xlu1 %249  ;;  %599 = vperm.xlu1 %1634, %v1943_v54  }
  0xf0   :  { %v281_v57 = vmul.f32 %v1971_v6, %v250_v62  ;;  %v304_v6 = vld [vmem:[%s2652_s3] sm:$0xf]  ;;  %v2194_v34 = vpop.permute.xlu0 %464  ;;  %v1486_v62 = vld [vmem:[%s2648_s2 + $0x90] sm:$0xff] }
  0xf2   :  { %v289_v3 = vadd.f32 %v281_v57, %v237_v50  ;;  %1651 = vset.pattern.permute.xlu0 %v1733_v7 }
  0xf3   :  { %1635 = vset.pattern.permute.xlu1 %v1732_v1  ;;  %865 = vperm.xlu0 %1651, %v1482_v15  }
  0xf4   :  { %v296_v33 = vpack.c.bf16 %v289_v3, %v288_v63  ;;  %v2088_v54 = vpop.permute.xlu1 %422  ;;  %772 = vperm.xlu1 %1635, %v1482_v15   ;;  %v2207_v47 = vpop.permute.xlu0 %459 }
  0xf6   :  { %v1687_v24 = vpop.eup %1686  ;;  %1688 = vtanh.bf16 %v296_v33 }
  0xf7   :  { %1540 = vmatpush3.bf16.msra.mxu0 %v1687_v24  ;;  %857 = vperm.xlu0 %1651, %v2123_v23  }
  0xf8   :  { %1541 = vmatprep.subr.bf16.mxu0 %v1735_v19  ;;  %v2090_v4 = vpop.permute.xlu1 %427  ;;  %777 = vperm.xlu1 %1635, %v2110_v41   ;;  %v398_v50 = vpop.permute.xlu0 %397 }
  0xfb   :  { %841 = vperm.xlu0 %1651, %v2201_v8  }
  0xfc   :  { %v2092_v45 = vpop.permute.xlu1 %479  ;;  %829 = vperm.xlu1 %1635, %v1491_v17   ;;  %v445_v33 = vpop.permute.xlu0 %444 }
  0xff   :  { %1653 = vset.pattern.permute.xlu0 %v1734_v14 }
 0x100   :  { %1636 = vset.pattern.permute.xlu1 %v1733_v7  ;;  %973 = vperm.xlu0 %1653, %v2110_v41   ;;  %v516_v24 = vpop.permute.xlu0 %515 }
 0x101   :  { %v2094_v5 = vpop.permute.xlu1 %519  ;;  %869 = vperm.xlu1 %1636, %v2110_v41  }
 0x104   :  { %v1689_v2 = vpop.eup %1688  ;;  %961 = vperm.xlu0 %1653, %v2123_v23  }
 0x105   :  { %1542 = vmatpush3.bf16.msra.mxu0 %v1689_v2  ;;  %1637 = vset.pattern.permute.xlu1 %v1732_v1 }
 0x106   :  { %1559 = vmatprep.subr.bf16.mxu0 %v1735_v19  ;;  %v2096_v10 = vpop.permute.xlu1 %412  ;;  %762 = vperm.xlu1 %1637, %v2123_v23  }
 0x108   :  { %1544 = vmatmul.mubr.msk.bf16.vlgmr.msra.gmra.mxu0 %vm311_vm1, %v304_v6  ;;  %957 = vperm.xlu0 %1653, %v1479_v32   ;;  %v508_v6 = vpop.permute.xlu0 %507 }
 0x109   :  { %1567 = vmatprep.mubr.msk.bf16.mxu0 %vm1736_vm0, %v1735_v19 }
 0x10a   :  { %1638 = vset.pattern.permute.xlu1 %v1731_v0 }
 0x10b   :  { %v2098_v11 = vpop.permute.xlu1 %567  ;;  %917 = vperm.xlu1 %1638, %v1482_v15  }
 0x10c   :  { %945 = vperm.xlu0 %1653, %v2201_v8  }
 0x10f   :  { %v2100_v12 = vpop.permute.xlu1 %571  ;;  %921 = vperm.xlu1 %1638, %v2110_v41  }
 0x110   :  { %1666 = vset.pattern.permute.xlu0 %v1731_v0 }
 0x113   :  { %1639 = vset.pattern.permute.xlu1 %v1732_v1 }
 0x114   :  { %v2105_v16 = vpop.permute.xlu1 %469  ;;  %819 = vperm.xlu1 %1639, %v1489_v37   ;;  %v2655_v37 = vsub.s32 5, %v1900_v40 }
 0x118   :  { %1640 = vset.pattern.permute.xlu1 %v1733_v7 }
 0x119   :  { %v2116_v20 = vpop.permute.xlu1 %511  ;;  %861 = vperm.xlu1 %1640, %v2145_v29  }
 0x11d   :  { %1641 = vset.pattern.permute.xlu1 %v1734_v14 }
 0x11e   :  { %v2125_v25 = vpop.permute.xlu1 %619  ;;  %969 = vperm.xlu1 %1641, %v1482_v15  }
 0x122   :  { %1642 = vset.pattern.permute.xlu1 %v1732_v1 }
 0x123   :  { %v2134_v26 = vpop.permute.xlu1 %402  ;;  %752 = vperm.xlu1 %1642, %v2184_v22  }
 0x127   :  { %v2140_v28 = vpop.permute.xlu1 %407  ;;  %757 = vperm.xlu1 %1642, %v1479_v32  }
 0x12b   :  { %1645 = vset.pattern.permute.xlu1 %v1731_v0 }
 0x12c   :  { %v2158_v43 = vpop.permute.xlu1 %563  ;;  %913 = vperm.xlu1 %1645, %v2145_v29  }
 0x130   :  { %1646 = vset.pattern.permute.xlu1 %v1732_v1 }
 0x131   :  { %v2170_v48 = vpop.permute.xlu1 %454  ;;  %804 = vperm.xlu1 %1646, %v1486_v62  }
 0x135   :  { %1647 = vset.pattern.permute.xlu1 %v1733_v7 }
 0x136   :  { %v2179_v35 = vpop.permute.xlu1 %499  ;;  %849 = vperm.xlu1 %1647, %v2184_v22  }
 0x13a   :  { %v2192_v31 = vpop.permute.xlu1 %503  ;;  %853 = vperm.xlu1 %1647, %v1479_v32  }
 0x13e   :  { %1648 = vset.pattern.permute.xlu1 %v1734_v14 }
 0x13f   :  { %v2203_v61 = vpop.permute.xlu1 %615  ;;  %965 = vperm.xlu1 %1648, %v2145_v29   ;;  %v492_v29 = vpop.permute.xlu0 %491 }
 0x143   :  { %1649 = vset.pattern.permute.xlu1 %v1732_v1 }
 0x144   :  { %v393_v42 = vpop.permute.xlu1 %392  ;;  %742 = vperm.xlu1 %1649, %v2201_v8  }
 0x148   :  { %1650 = vset.pattern.permute.xlu1 %v1731_v0 }
 0x149   :  { %v2221_v3 = vpop.permute.xlu1 %551  ;;  %901 = vperm.xlu1 %1650, %v2184_v22  }
 0x14d   :  { %v2224_v2 = vpop.permute.xlu1 %555  ;;  %905 = vperm.xlu1 %1650, %v1479_v32  }
 0x151   :  { %1652 = vset.pattern.permute.xlu1 %v1732_v1 }
 0x152   :  { %v450_v15 = vpop.permute.xlu1 %449 }
 0x157   :  { %v496_v36 = vpop.permute.xlu1 %495 }
 0x1c8   :  { %v349_v30 = vpop.f32.mrf.mxu0 }
 0x1c9   :  { %v350_v58 = vadd.f32 %v349_v30, %v309_v38  ;;  %v1485_v30 = vld [vmem:[%s2648_s2 + $0x88] sm:$0xff] }
 0x1ca   :  { %v1545_v59 = vpop.f32.mrf.mxu0  ;;  %799 = vperm.xlu1 %1652, %v1485_v30  }
 0x1cb   :  { %1690 = vtanh.f32 %v350_v58 }
 0x1cc   :  { %v352_v13 = vpop.f32.mrf.mxu0 }
 0x1cd   :  { %v624_v13 = vpop.permute.xlu0 %623 }
 0x1ce   :  { %v1546_v52 = vpop.f32.mrf.mxu0  ;;  %1654 = vset.pattern.permute.xlu1 %v1733_v7 }
 0x1cf   :  { %v2250_v52 = vpop.permute.xlu1 %603  ;;  %845 = vperm.xlu1 %1654, %v2167_v39  }
 0x1d3   :  { %1655 = vset.pattern.permute.xlu1 %v1734_v14 }
 0x1d4   :  { %953 = vperm.xlu1 %1655, %v2184_v22  }
 0x1d8   :  { %v2215_v57 = vpop.eup %1690  ;;  %1656 = vset.pattern.permute.xlu1 %v1731_v0 }
 0x1d9   :  { %v356_v63 = vmul.f32 1.442695, %v2215_v57  ;;  %893 = vperm.xlu1 %1656, %v2201_v8  }
 0x1db   :  { %1692 = vpow2.f32 %v356_v63 }
 0x1dd   :  { %897 = vperm.xlu1 %1656, %v2167_v39  }
 0x1e1   :  { %1657 = vset.pattern.permute.xlu1 %v1734_v14 }
 0x1e2   :  { %949 = vperm.xlu1 %1657, %v2167_v39   ;;  %v1473_v39 = vld [vmem:[%s2652_s3 + $0x4] sm:$0xf] }
 0x1e6   :  { %1658 = vset.pattern.permute.xlu1 %v1732_v1 }
 0x1e8   :  { %v1693_v41 = vpop.eup %1692 }
 0x1e9   :  { %v359_v17 = vrot.slane %v1693_v41, 4 }
 0x1eb   :  { %v361_v23 = vmul.f32 %v359_v17, %v1921_v46 }
 0x1ed   :  { %v2235_v27 = vadd.f32 %v361_v23, %v350_v58  ;;  %v2657_v58 = vsub.s32 7, %v1900_v40 }
 0x1ef   :  { %v433_v9 = vrot.slane %v2235_v27, %v2658_v18  ;;  %v525_v46 = vrot.slane %v2235_v27, %v2655_v37 }
 0x1f1   :  { %v439_v38 = vmul.f32 %v433_v9, %v418_v56  ;;  %v440_v59 = vmul.f32 %v433_v9, %v2088_v54  ;;  %v436_v32 = vmul.f32 %v433_v9, %v2134_v26  ;;  %v437_v63 = vmul.f32 %v433_v9, %v2140_v28 }
 0x1f2   :  { %v438_v41 = vmul.f32 %v433_v9, %v2096_v10  ;;  %v577_v54 = vrot.slane %v2235_v27, %v2656_v53  ;;  %v532_v17 = vmul.f32 %v525_v46, %v516_v24  ;;  %v2264_v26 = vrot.slane %v2235_v27, %v2657_v58  ;;  %v612_v53 = vpop.permute.xlu0 %611  ;;  %v544_v24 = vpop.permute.xlu1 %543 }
 0x1f3   :  { %v487_v56 = vadd.f32 %v2105_v16, %v439_v38  ;;  %v488_v62 = vadd.f32 %v2173_v49, %v440_v59  ;;  %v531_v23 = vmul.f32 %v525_v46, %v2116_v20  ;;  %v434_v16 = vmul.f32 %v433_v9, %v393_v42 }
 0x1f4   :  { %v486_v49 = vadd.f32 %v2194_v34, %v438_v41  ;;  %v530_v28 = vmul.f32 %v525_v46, %v508_v6  ;;  %v484_v10 = vadd.f32 %v2170_v48, %v436_v32  ;;  %v485_v30 = vadd.f32 %v2207_v47, %v437_v63 }
 0x1f5   :  { %v540_v38 = vadd.f32 %v532_v17, %v488_v62  ;;  %v539_v59 = vadd.f32 %v531_v23, %v487_v56  ;;  %v435_v37 = vmul.f32 %v433_v9, %v398_v50  ;;  %v583_v58 = vmul.f32 %v577_v54, %v2158_v43 }
 0x1f6   :  { %v584_v18 = vmul.f32 %v577_v54, %v2098_v11  ;;  %v538_v20 = vadd.f32 %v530_v28, %v486_v49  ;;  %v441_v42 = vmul.f32 %v433_v9, %v2090_v4  ;;  %v635_v34 = vmul.f32 %v2264_v26, %v2203_v61 }
 0x1f7   :  { %v482_v48 = vadd.f32 %v445_v33, %v434_v16  ;;  %v528_v47 = vmul.f32 %v525_v46, %v2179_v35  ;;  %v529_v50 = vmul.f32 %v525_v46, %v2192_v31  ;;  %v533_v43 = vmul.f32 %v525_v46, %v2094_v5 }
 0x1f8   :  { %v592_v6 = vadd.f32 %v584_v18, %v540_v38  ;;  %v489_v32 = vadd.f32 %v2092_v45, %v441_v42  ;;  %v582_v11 = vmul.f32 %v577_v54, %v2149_v21  ;;  %v591_v56 = vadd.f32 %v583_v58, %v539_v59  ;;  %v608_v21 = vpop.permute.xlu0 %607  ;;  %v548_v18 = vpop.permute.xlu1 %547 }
 0x1f9   :  { %v536_v62 = vadd.f32 %v528_v47, %v484_v10  ;;  %v537_v4 = vadd.f32 %v529_v50, %v485_v30  ;;  %v483_v9 = vadd.f32 %v450_v15, %v435_v37  ;;  %v585_v41 = vmul.f32 %v577_v54, %v2100_v12 }
 0x1fa   :  { %v541_v63 = vadd.f32 %v533_v43, %v489_v32  ;;  %v636_v61 = vmul.f32 %v2264_v26, %v2125_v25  ;;  %v590_v35 = vadd.f32 %v582_v11, %v538_v20  ;;  %v580_v31 = vmul.f32 %v577_v54, %v2221_v3 }
 0x1fb   :  { %v581_v45 = vmul.f32 %v577_v54, %v2224_v2  ;;  %v526_v5 = vmul.f32 %v525_v46, %v492_v29  ;;  %v527_v33 = vmul.f32 %v525_v46, %v496_v36  ;;  %v637_v37 = vmul.f32 %v2264_v26, %v624_v13 }
 0x1fc   :  { %v593_v15 = vadd.f32 %v585_v41, %v541_v63  ;;  %v644_v12 = vadd.f32 %v636_v61, %v592_v6  ;;  %v634_v58 = vmul.f32 %v2264_v26, %v612_v53  ;;  %v643_v25 = vadd.f32 %v635_v34, %v591_v56  ;;  %v596_v28 = vpop.permute.xlu0 %595  ;;  %v600_v59 = vpop.permute.xlu1 %599  ;;  %v1501_v63 = vld [vmem:[%s2649_s1 + $0xf0] sm:$0xff]  ;;  %v2334_v41 = vld [vmem:[%s2649_s1 + $0xf8] sm:$0xff] }
 0x1fd   :  { %v588_v17 = vadd.f32 %v580_v31, %v536_v62  ;;  %v534_v23 = vadd.f32 %v526_v5, %v482_v48  ;;  %v589_v16 = vadd.f32 %v581_v45, %v537_v4  ;;  %v535_v49 = vadd.f32 %v527_v33, %v483_v9  ;;  %1122 = vperm.xlu1 %1658, %v1501_v63   ;;  %v2345_v31 = vld [vmem:[%s2649_s1 + $0xe0] sm:$0xff]  ;;  %v1493_v5 = vld [vmem:[%s2650_s4 + $0x10] sm:$0xff] }
 0x1fe   :  { %v645_v3 = vadd.f32 %v637_v37, %v593_v15  ;;  %v642_v38 = vadd.f32 %v634_v58, %v590_v35  ;;  %v632_v2 = vmul.f32 %v2264_v26, %v2250_v52  ;;  %v578_v29 = vmul.f32 %v577_v54, %v544_v24  ;;  %v1510_v35 = vld [vmem:[%s2648_s2 + $0xf8] sm:$0xff]  ;;  %1259 = vperm.xlu0 %1666, %v2345_v31   ;;  %v2369_v15 = vld [vmem:[%s2649_s1 + $0xe8] sm:$0xff] }
 0x1ff   :  { %v633_v36 = vmul.f32 %v2264_v26, %v608_v21  ;;  %v579_v46 = vmul.f32 %v577_v54, %v548_v18  ;;  %v630_v42 = vmul.f32 %v2264_v26, %v596_v28  ;;  %v631_v52 = vmul.f32 %v2264_v26, %v600_v59  ;;  %v1509_v21 = vld [vmem:[%s2648_s2 + $0xf0] sm:$0xff] }
 0x200   :  { %v649_v22 = vpack.c.bf16 %v645_v3, %v644_v12  ;;  %v640_v53 = vadd.f32 %v632_v2, %v588_v17  ;;  %v586_v13 = vadd.f32 %v578_v29, %v534_v23  ;;  %v648_v10 = vpack.c.bf16 %v643_v25, %v642_v38  ;;  %v2312_v6 = vpop.permute.xlu1 %772  ;;  %v2372_v37 = vpop.permute.xlu0 %909  ;;  %v1507_v12 = vld [vmem:[%s2648_s2 + $0xe0] sm:$0xff]  ;;  %v1508_v25 = vld [vmem:[%s2648_s2 + $0xe8] sm:$0xff]  ;;  %v1506_v17 = vld [vmem:[%s2648_s2 + $0xd8] sm:$0xff] }
 0x201   :  { %v641_v30 = vadd.f32 %v633_v36, %v589_v16  ;;  %v587_v20 = vadd.f32 %v579_v46, %v535_v49  ;;  %1127 = vperm.xlu1 %1658, %v2334_v41   ;;  %v2390_v16 = vld [vmem:[%s2649_s1 + $0xc8] sm:$0xff]  ;;  %v1503_v38 = vld [vmem:[%s2648_s2 + $0xc0] sm:$0xff] }
 0x202   :  { %1694 = vtanh.bf16 %v649_v22  ;;  %v638_v34 = vadd.f32 %v630_v42, %v586_v13  ;;  %1667 = vset.pattern.permute.xlu0 %v1732_v1  ;;  %v2410_v22 = vld [vmem:[%s2649_s1 + $0xd0] sm:$0xff] }
 0x203   :  { %1696 = vtanh.bf16 %v648_v10  ;;  %v647_v24 = vpack.c.bf16 %v641_v30, %v640_v53  ;;  %v639_v54 = vadd.f32 %v631_v52, %v587_v20  ;;  %1010 = vperm.xlu0 %1667, %v1493_v5   ;;  %v2420_v53 = vld [vmem:[%s2649_s1 + $0xd8] sm:$0xff]  ;;  %v2429_v30 = vld [vmem:[%s2649_s1 + $0xc0] sm:$0xff]  ;;  %v364_v20 = vsel %vm363_vm2, %v2215_v57, 0.0 }
 0x204   :  { %v2314_v32 = vpop.permute.xlu1 %777  ;;  %v661_v23 = vpop.permute.xlu0 %660 }
 0x205   :  { %1698 = vtanh.bf16 %v647_v24  ;;  %v646_v8 = vpack.c.bf16 %v639_v54, %v638_v34  ;;  %1179 = vperm.xlu1 %1658, %v1510_v35   ;;  %v365_v34 = vrot.slane %v364_v20, 4  ;;  %v1505_v54 = vld [vmem:[%s2648_s2 + $0xd0] sm:$0xff] }
 0x207   :  { %1700 = vtanh.bf16 %v646_v8  ;;  %1174 = vperm.xlu0 %1667, %v1509_v21   ;;  %v366_v8 = vadd.f32 %v365_v34, %v364_v20 }
 0x208   :  { %v2316_v43 = vpop.permute.xlu1 %829  ;;  %v2396_v3 = vpop.permute.xlu0 %824 }
 0x209   :  { %1659 = vset.pattern.permute.xlu1 %v1733_v7 }
 0x20a   :  { %1219 = vperm.xlu1 %1659, %v2334_v41  }
 0x20b   :  { %1117 = vperm.xlu0 %1667, %v2369_v15  }
 0x20c   :  { %v2318_v11 = vpop.permute.xlu1 %869  ;;  %v2405_v29 = vpop.permute.xlu0 %767 }
 0x20e   :  { %1660 = vset.pattern.permute.xlu1 %v1732_v1 }
 0x20f   :  { %1112 = vperm.xlu1 %1660, %v2345_v31   ;;  %1164 = vperm.xlu0 %1667, %v1507_v12  }
 0x210   :  { %v1695_v48 = vpop.eup %1694  ;;  %v2320_v56 = vpop.permute.xlu1 %762 }
 0x211   :  { %1548 = vmatpush3.bf16.msra.mxu1 %v1695_v48  ;;  %v1697_v26 = vpop.eup %1696  ;;  %v2422_v13 = vpop.permute.xlu0 %814 }
 0x212   :  { %1549 = vmatprep.subr.bf16.mxu1 %v1735_v19 }
 0x213   :  { %v1699_v47 = vpop.eup %1698  ;;  %1661 = vset.pattern.permute.xlu1 %v1731_v0  ;;  %1159 = vperm.xlu0 %1667, %v1506_v17  }
 0x214   :  { %v2322_v62 = vpop.permute.xlu1 %917  ;;  %1267 = vperm.xlu1 %1661, %v1501_v63  }
 0x215   :  { %1550 = vmatpush3.bf16.msra.mxu1 %v1697_v26  ;;  %v1701_v50 = vpop.eup %1700  ;;  %v2436_v24 = vpop.permute.xlu0 %809 }
 0x216   :  { %1551 = vmatprep.subr.bf16.mxu1 %v1735_v19 }
 0x217   :  { %1097 = vperm.xlu0 %1667, %v2390_v16  }
 0x218   :  { %v2324_v4 = vpop.permute.xlu1 %921  ;;  %1271 = vperm.xlu1 %1661, %v2334_v41  }
 0x219   :  { %1552 = vmatpush3.bf16.msra.mxu1 %v1699_v47  ;;  %v2448_v48 = vpop.permute.xlu0 %747  ;;  %v367_v47 = vrot.slane %v366_v8, 2 }
 0x21a   :  { %1553 = vmatprep.subr.bf16.mxu1 %v1735_v19 }
 0x21b   :  { %1144 = vperm.xlu0 %1667, %v1503_v38   ;;  %v368_v5 = vadd.f32 %v367_v47, %v366_v8 }
 0x21c   :  { %v2326_v9 = vpop.permute.xlu1 %819  ;;  %1662 = vset.pattern.permute.xlu1 %v1732_v1 }
 0x21d   :  { %1554 = vmatpush3.bf16.msra.mxu1 %v1701_v50  ;;  %1169 = vperm.xlu1 %1662, %v1508_v25   ;;  %v2457_v35 = vpop.permute.xlu0 %794  ;;  %v369_v17 = vrot.slane %v368_v5, 1 }
 0x21e   :  { %1571 = vmatprep.subr.bf16.mxu1 %v1735_v19 }
 0x21f   :  { %1674 = vset.pattern.permute.xlu0 %v1733_v7 }
 0x220   :  { %1556 = vmatmul.mubr.msk.bf16.vlgmr.msra.gmra.mxu1 %vm311_vm1, %v1473_v39  ;;  %v2337_v61 = vpop.permute.xlu1 %861  ;;  %1215 = vperm.xlu0 %1674, %v1501_v63  }
 0x221   :  { %1579 = vmatprep.mubr.msk.bf16.mxu1 %vm1736_vm0, %v1735_v19  ;;  %1663 = vset.pattern.permute.xlu1 %v1733_v7  ;;  %v866_v12 = vpop.permute.xlu0 %865 }
 0x222   :  { %1211 = vperm.xlu1 %1663, %v2369_v15  }
 0x224   :  { %v2347_v45 = vpop.permute.xlu1 %969  ;;  %1207 = vperm.xlu0 %1674, %v2345_v31  }
 0x226   :  { %1664 = vset.pattern.permute.xlu1 %v1734_v14 }
 0x227   :  { %1319 = vperm.xlu1 %1664, %v1501_v63  }
 0x228   :  { %v2356_v33 = vpop.permute.xlu1 %752  ;;  %1191 = vperm.xlu0 %1674, %v2429_v30  }
 0x22b   :  { %1665 = vset.pattern.permute.xlu1 %v1732_v1 }
 0x22c   :  { %v2364_v18 = vpop.permute.xlu1 %757  ;;  %1102 = vperm.xlu1 %1665, %v2410_v22   ;;  %1676 = vset.pattern.permute.xlu0 %v1734_v14 }
 0x22d   :  { %1323 = vperm.xlu0 %1676, %v2334_v41  }
 0x230   :  { %v2378_v58 = vpop.permute.xlu1 %913  ;;  %1107 = vperm.xlu1 %1665, %v2420_v53  }
 0x231   :  { %1311 = vperm.xlu0 %1676, %v2345_v31  }
 0x234   :  { %v2392_v49 = vpop.permute.xlu1 %804  ;;  %1668 = vset.pattern.permute.xlu1 %v1731_v0 }
 0x235   :  { %1263 = vperm.xlu1 %1668, %v2369_v15   ;;  %1307 = vperm.xlu0 %1676, %v2420_v53  }
 0x238   :  { %v2402_v2 = vpop.permute.xlu1 %849 }
 0x239   :  { %1669 = vset.pattern.permute.xlu1 %v1732_v1  ;;  %1295 = vperm.xlu0 %1676, %v2429_v30  }
 0x23a   :  { %1154 = vperm.xlu1 %1669, %v1505_v54   ;;  %v1730_v54 = vld [vmem:[%s2651_s0] sm:$0xff] }
 0x23c   :  { %v2414_v36 = vpop.permute.xlu1 %853 }
 0x23d   :  { %1681 = vset.pattern.permute.xlu0 %v1732_v1 }
 0x23e   :  { %1670 = vset.pattern.permute.xlu1 %v1733_v7 }
 0x23f   :  { %1199 = vperm.xlu1 %1670, %v2410_v22  }
 0x240   :  { %v2433_v42 = vpop.permute.xlu1 %965 }
 0x243   :  { %1203 = vperm.xlu1 %1670, %v2420_v53  }
 0x244   :  { %v2445_v57 = vpop.permute.xlu1 %742 }
 0x247   :  { %1671 = vset.pattern.permute.xlu1 %v1734_v14 }
 0x248   :  { %v2452_v63 = vpop.permute.xlu1 %901  ;;  %1315 = vperm.xlu1 %1671, %v2369_v15  }
 0x24c   :  { %v2461_v25 = vpop.permute.xlu1 %905  ;;  %1672 = vset.pattern.permute.xlu1 %v1732_v1 }
 0x24d   :  { %1092 = vperm.xlu1 %1672, %v2429_v30  }
 0x250   :  { %v800_v20 = vpop.permute.xlu1 %799 }
 0x251   :  { %1673 = vset.pattern.permute.xlu1 %v1731_v0 }
 0x252   :  { %1251 = vperm.xlu1 %1673, %v2410_v22  }
 0x256   :  { %1255 = vperm.xlu1 %1673, %v2420_v53  }
 0x25a   :  { %1675 = vset.pattern.permute.xlu1 %v1732_v1 }
 0x2e0   :  { %v700_v46 = vpop.f32.mrf.mxu1 }
 0x2e1   :  { %v701_v28 = vadd.f32 %v700_v46, %v661_v23  ;;  %v370_v46 = vadd.f32 %v369_v17, %v368_v5 }
 0x2e2   :  { %v1557_v59 = vpop.f32.mrf.mxu1 }
 0x2e3   :  { %1702 = vtanh.f32 %v701_v28 }
 0x2e4   :  { %v703_v10 = vpop.f32.mrf.mxu1 }
 0x2e5   :  { %v858_v10 = vpop.permute.xlu0 %857 }
 0x2e6   :  { %v1558_v52 = vpop.f32.mrf.mxu1 }
 0x2e9   :  { %v842_v15 = vpop.permute.xlu0 %841 }
 0x2f0   :  { %v1703_v26 = vpop.eup %1702 }
 0x2f1   :  { %v707_v50 = vmul.f32 1.442695, %v1703_v26  ;;  %v714_v39 = vsel %vm363_vm2, %v1703_v26, 0.0  ;;  %v711_v26 = vrot.slane %v701_v28, 4 }
 0x2f2   :  { %v715_v41 = vrot.slane %v714_v39, 4 }
 0x2f3   :  { %1704 = vpow2.f32 %v707_v50  ;;  %v846_v50 = vpop.permute.xlu1 %845 }
 0x2f4   :  { %v716_v21 = vadd.f32 %v715_v41, %v714_v39 }
 0x2f6   :  { %v717_v31 = vrot.slane %v716_v21, 2 }
 0x2f8   :  { %v718_v23 = vadd.f32 %v717_v31, %v716_v21  ;;  %v974_v21 = vpop.permute.xlu0 %973  ;;  %v2485_v31 = vpop.permute.xlu1 %953 }
 0x2fa   :  { %v719_v38 = vrot.slane %v718_v23, 1 }
 0x2fc   :  { %v720_v59 = vadd.f32 %v719_v38, %v718_v23 }
 0x2fe   :  { %v2466_v52 = vadd.f32 %v720_v59, %v370_v46 }
 0x300   :  { %v1705_v34 = vpop.eup %1704 }
 0x301   :  { %v709_v8 = vmul.f32 %v1730_v54, %v1705_v34  ;;  %v894_v54 = vpop.permute.xlu1 %893 }
 0x303   :  { %v2473_v47 = vadd.f32 %v711_v26, %v709_v8 }
 0x305   :  { %v783_v39 = vrot.slane %v2473_v47, %v82_v44  ;;  %v875_v5 = vrot.slane %v2473_v47, %v174_v51  ;;  %v1504_v51 = vld [vmem:[%s2648_s2 + $0xc8] sm:$0xff] }
 0x306   :  { %1149 = vperm.xlu1 %1675, %v1504_v51  }
 0x307   :  { %v789_v41 = vmul.f32 %v783_v39, %v2405_v29  ;;  %v790_v28 = vmul.f32 %v783_v39, %v2312_v6  ;;  %v786_v17 = vmul.f32 %v783_v39, %v2356_v33  ;;  %v787_v38 = vmul.f32 %v783_v39, %v2364_v18 }
 0x308   :  { %v788_v29 = vmul.f32 %v783_v39, %v2320_v56  ;;  %v927_v6 = vrot.slane %v2473_v47, %v226_v55  ;;  %v882_v46 = vmul.f32 %v875_v5, %v866_v12  ;;  %v2502_v33 = vrot.slane %v2473_v47, %v278_v60  ;;  %v962_v60 = vpop.permute.xlu0 %961 }
 0x309   :  { %v837_v23 = vadd.f32 %v2326_v9, %v789_v41  ;;  %v838_v44 = vadd.f32 %v2396_v3, %v790_v28  ;;  %v881_v9 = vmul.f32 %v875_v5, %v2337_v61  ;;  %v784_v18 = vmul.f32 %v783_v39, %v2445_v57 }
 0x30a   :  { %v836_v56 = vadd.f32 %v2422_v13, %v788_v29  ;;  %v880_v53 = vmul.f32 %v875_v5, %v858_v10  ;;  %v834_v55 = vadd.f32 %v2392_v49, %v786_v17  ;;  %v835_v12 = vadd.f32 %v2436_v24, %v787_v38  ;;  %1677 = vset.pattern.permute.xlu1 %v1733_v7 }
 0x30b   :  { %v890_v3 = vadd.f32 %v882_v46, %v838_v44  ;;  %v889_v59 = vadd.f32 %v881_v9, %v837_v23  ;;  %v785_v34 = vmul.f32 %v783_v39, %v2448_v48  ;;  %v933_v61 = vmul.f32 %v927_v6, %v2378_v58  ;;  %1195 = vperm.xlu1 %1677, %v2390_v16   ;;  %v898_v23 = vpop.permute.xlu1 %897 }
 0x30c   :  { %v934_v57 = vmul.f32 %v927_v6, %v2322_v62  ;;  %v888_v8 = vadd.f32 %v880_v53, %v836_v56  ;;  %v791_v13 = vmul.f32 %v783_v39, %v2314_v32  ;;  %v985_v1 = vmul.f32 %v2502_v33, %v2433_v42  ;;  %v958_v7 = vpop.permute.xlu0 %957 }
 0x30d   :  { %v832_v10 = vadd.f32 %v2457_v35, %v784_v18  ;;  %v878_v49 = vmul.f32 %v875_v5, %v2402_v2  ;;  %v879_v24 = vmul.f32 %v875_v5, %v2414_v36  ;;  %v883_v41 = vmul.f32 %v875_v5, %v2318_v11 }
 0x30e   :  { %v942_v26 = vadd.f32 %v934_v57, %v890_v3  ;;  %v839_v48 = vadd.f32 %v2316_v43, %v791_v13  ;;  %v932_v58 = vmul.f32 %v927_v6, %v2372_v37  ;;  %v941_v62 = vadd.f32 %v933_v61, %v889_v59 }
 0x30f   :  { %v886_v32 = vadd.f32 %v878_v49, %v834_v55  ;;  %v887_v39 = vadd.f32 %v879_v24, %v835_v12  ;;  %v833_v28 = vadd.f32 %v800_v20, %v785_v34  ;;  %v935_v2 = vmul.f32 %v927_v6, %v2324_v4  ;;  %1678 = vset.pattern.permute.xlu1 %v1734_v14  ;;  %v950_v59 = vpop.permute.xlu1 %949 }
 0x310   :  { %v891_v42 = vadd.f32 %v883_v41, %v839_v48  ;;  %v986_v36 = vmul.f32 %v2502_v33, %v2347_v45  ;;  %v940_v35 = vadd.f32 %v932_v58, %v888_v8  ;;  %v930_v43 = vmul.f32 %v927_v6, %v2452_v63  ;;  %1303 = vperm.xlu1 %1678, %v2410_v22   ;;  %v946_v53 = vpop.permute.xlu0 %945  ;;  %v1512_v41 = vld [vmem:[%s2650_s4 + $0x18] sm:$0xff] }
 0x311   :  { %v931_v11 = vmul.f32 %v927_v6, %v2461_v25  ;;  %v876_v37 = vmul.f32 %v875_v5, %v842_v15  ;;  %v877_v17 = vmul.f32 %v875_v5, %v846_v50  ;;  %v987_v20 = vmul.f32 %v2502_v33, %v974_v21  ;;  %1360 = vperm.xlu0 %1681, %v1512_v41  }
 0x312   :  { %v943_v44 = vadd.f32 %v935_v2, %v891_v42  ;;  %v994_v38 = vadd.f32 %v986_v36, %v942_v26  ;;  %v984_v29 = vmul.f32 %v2502_v33, %v962_v60  ;;  %v993_v51 = vadd.f32 %v985_v1, %v941_v62 }
 0x313   :  { %v938_v4 = vadd.f32 %v930_v43, %v886_v32  ;;  %v884_v46 = vadd.f32 %v876_v37, %v832_v10  ;;  %v939_v45 = vadd.f32 %v931_v11, %v887_v39  ;;  %v885_v9 = vadd.f32 %v877_v17, %v833_v28 }
 0x314   :  { %v995_v63 = vadd.f32 %v987_v20, %v943_v44  ;;  %v992_v18 = vadd.f32 %v984_v29, %v940_v35  ;;  %v982_v25 = vmul.f32 %v2502_v33, %v2485_v31  ;;  %v928_v15 = vmul.f32 %v927_v6, %v894_v54  ;;  %1679 = vset.pattern.permute.xlu1 %v1731_v0  ;;  %v2569_v39 = vpop.permute.xlu0 %1259 }
 0x315   :  { %v983_v5 = vmul.f32 %v2502_v33, %v958_v7  ;;  %v929_v21 = vmul.f32 %v927_v6, %v898_v23  ;;  %1243 = vperm.xlu1 %1679, %v2429_v30   ;;  %v980_v22 = vmul.f32 %v2502_v33, %v946_v53  ;;  %v981_v31 = vmul.f32 %v2502_v33, %v950_v59 }
 0x316   :  { %v999_v50 = vpack.c.bf16 %v995_v63, %v994_v38  ;;  %v990_v56 = vadd.f32 %v982_v25, %v938_v4  ;;  %v936_v3 = vadd.f32 %v928_v15, %v884_v46  ;;  %v998_v55 = vpack.c.bf16 %v993_v51, %v992_v18 }
 0x317   :  { %v991_v12 = vadd.f32 %v983_v5, %v939_v45  ;;  %v937_v34 = vadd.f32 %v929_v21, %v885_v9 }
 0x318   :  { %1706 = vtanh.bf16 %v999_v50  ;;  %v988_v54 = vadd.f32 %v980_v22, %v936_v3  ;;  %v1011_v42 = vpop.permute.xlu0 %1010 }
 0x319   :  { %1708 = vtanh.bf16 %v998_v55  ;;  %v997_v60 = vpack.c.bf16 %v991_v12, %v990_v56  ;;  %v989_v6 = vadd.f32 %v981_v31, %v937_v34  ;;  %1247 = vperm.xlu1 %1679, %v2390_v16  }
 0x31b   :  { %1710 = vtanh.bf16 %v997_v60  ;;  %v996_v61 = vpack.c.bf16 %v989_v6, %v988_v54 }
 0x31c   :  { %v1175_v36 = vpop.permute.xlu0 %1174 }
 0x31d   :  { %1680 = vset.pattern.permute.xlu1 %v1734_v14  ;;  %1712 = vtanh.bf16 %v996_v61  ;;  %v1492_v14 = vld [vmem:[%s2652_s3 + $0x8] sm:$0xf]  ;;  %v2659_v61 = vsub.s32 4, %v1900_v40 }
 0x31e   :  { %1299 = vperm.xlu1 %1680, %v2390_v16   ;;  %v1123_v16 = vpop.permute.xlu1 %1122 }
 0x320   :  { %v1118_v43 = vpop.permute.xlu0 %1117 }
 0x322   :  { %v2550_v8 = vpop.permute.xlu1 %1127 }
 0x324   :  { %v1165_v23 = vpop.permute.xlu0 %1164 }
 0x326   :  { %v1707_v0 = vpop.eup %1706  ;;  %v2552_v13 = vpop.permute.xlu1 %1179 }
 0x327   :  { %1560 = vmatpush3.bf16.msra.mxu0 %v1707_v0  ;;  %v1709_v30 = vpop.eup %1708 }
 0x328   :  { %1561 = vmatprep.subr.bf16.mxu0 %v1735_v19  ;;  %v1160_v29 = vpop.permute.xlu0 %1159 }
 0x329   :  { %v1711_v33 = vpop.eup %1710 }
 0x32a   :  { %v2554_v1 = vpop.permute.xlu1 %1219 }
 0x32b   :  { %1562 = vmatpush3.bf16.msra.mxu0 %v1709_v30  ;;  %v1713_v57 = vpop.eup %1712  ;;  %v2660_v30 = vsub.s32 5, %v1900_v40 }
 0x32c   :  { %1563 = vmatprep.subr.bf16.mxu0 %v1735_v19  ;;  %v1098_v4 = vpop.permute.xlu0 %1097 }
 0x32e   :  { %v2556_v10 = vpop.permute.xlu1 %1112 }
 0x32f   :  { %1564 = vmatpush3.bf16.msra.mxu0 %v1711_v33 }
 0x330   :  { %1565 = vmatprep.subr.bf16.mxu0 %v1735_v19  ;;  %v1145_v15 = vpop.permute.xlu0 %1144 }
 0x332   :  { %v2558_v49 = vpop.permute.xlu1 %1267 }
 0x333   :  { %1566 = vmatpush3.bf16.msra.mxu0 %v1713_v57 }
 0x334   :  { %v1216_v21 = vpop.permute.xlu0 %1215 }
 0x336   :  { %1568 = vmatmul.mubr.msk.bf16.vlgmr.msra.gmra.mxu0 %vm311_vm1, %v1492_v14  ;;  %v2560_v24 = vpop.permute.xlu1 %1271 }
 0x338   :  { %v1208_v55 = vpop.permute.xlu0 %1207 }
 0x33a   :  { %v1170_v26 = vpop.permute.xlu1 %1169 }
 0x33c   :  { %v1192_v54 = vpop.permute.xlu0 %1191 }
 0x33e   :  { %v2562_v48 = vpop.permute.xlu1 %1211 }
 0x342   :  { %v2567_v58 = vpop.permute.xlu1 %1319 }
 0x346   :  { %v1103_v62 = vpop.permute.xlu1 %1102 }
 0x34a   :  { %v1108_v32 = vpop.permute.xlu1 %1107 }
 0x34e   :  { %v2571_v28 = vpop.permute.xlu1 %1263 }
 0x352   :  { %v1155_v2 = vpop.permute.xlu1 %1154 }
 0x356   :  { %v2573_v35 = vpop.permute.xlu1 %1199 }
 0x35a   :  { %v2575_v37 = vpop.permute.xlu1 %1203 }
 0x35e   :  { %v1316_v38 = vpop.permute.xlu1 %1315 }
 0x362   :  { %v1093_v51 = vpop.permute.xlu1 %1092 }
 0x366   :  { %v2578_v18 = vpop.permute.xlu1 %1251 }
 0x36a   :  { %v1256_v56 = vpop.permute.xlu1 %1255 }
 0x381   :  { %v1150_v12 = vpop.permute.xlu1 %1149 }
 0x386   :  { %v1196_v6 = vpop.permute.xlu1 %1195 }
 0x38b   :  { %v1304_v14 = vpop.permute.xlu1 %1303 }
 0x3f6   :  { %v1050_v11 = vpop.f32.mrf.mxu0 }
 0x3f7   :  { %v1051_v17 = vadd.f32 %v1050_v11, %v1011_v42 }
 0x3f8   :  { %v1569_v7 = vpop.f32.mrf.mxu0 }
 0x3f9   :  { %1714 = vtanh.f32 %v1051_v17  ;;  %v2661_v7 = vsub.s32 6, %v1900_v40 }
 0x3fa   :  { %v1053_v44 = vpop.f32.mrf.mxu0 }
 0x3fc   :  { %v1570_v20 = vpop.f32.mrf.mxu0 }
 0x406   :  { %v1715_v46 = vpop.eup %1714 }
 0x407   :  { %v1057_v45 = vmul.f32 1.442695, %v1715_v46  ;;  %v1064_v9 = vsel %vm363_vm2, %v1715_v46, 0.0 }
 0x408   :  { %v1065_v63 = vrot.slane %v1064_v9, 4 }
 0x409   :  { %1716 = vpow2.f32 %v1057_v45 }
 0x40a   :  { %v1066_v25 = vadd.f32 %v1065_v63, %v1064_v9 }
 0x40c   :  { %v1067_v50 = vrot.slane %v1066_v25, 2 }
 0x40e   :  { %v1068_v5 = vadd.f32 %v1067_v50, %v1066_v25 }
 0x410   :  { %v1069_v3 = vrot.slane %v1068_v5, 1 }
 0x412   :  { %v1070_v53 = vadd.f32 %v1069_v3, %v1068_v5  ;;  %v1244_v3 = vpop.permute.xlu1 %1243 }
 0x414   :  { %v2581_v59 = vadd.f32 %v1070_v53, %v2466_v52 }
 0x416   :  { %v1717_v34 = vpop.eup %1716 }
 0x417   :  { %v1060_v22 = vrot.slane %v1717_v34, 4 }
 0x419   :  { %v1062_v31 = vmul.f32 %v1060_v22, %v2235_v27  ;;  %v1324_v27 = vpop.permute.xlu0 %1323 }
 0x41b   :  { %v2584_v60 = vadd.f32 %v1062_v31, %v1051_v17 }
 0x41d   :  { %v1133_v0 = vrot.slane %v2584_v60, %v2659_v61  ;;  %1423 = vst [vmem:[%s2653_s5] sm:$0xf0] %v2584_v60  ;;  %v1225_v33 = vrot.slane %v2584_v60, %v2660_v30  ;;  %v1277_v44 = vrot.slane %v2584_v60, %v2661_v7  ;;  %v1312_v5 = vpop.permute.xlu0 %1311 }
 0x41f   :  { %v1139_v52 = vmul.f32 %v1133_v0, %v1118_v43  ;;  %v1140_v57 = vmul.f32 %v1133_v0, %v1123_v16  ;;  %v1136_v42 = vmul.f32 %v1133_v0, %v1103_v62  ;;  %v1137_v17 = vmul.f32 %v1133_v0, %v1108_v32 }
 0x420   :  { %v1232_v20 = vmul.f32 %v1225_v33, %v1216_v21  ;;  %v1138_v46 = vmul.f32 %v1133_v0, %v2556_v10  ;;  %v2662_v43 = vsub.s32 7, %v1900_v40  ;;  %v1231_v16 = vmul.f32 %v1225_v33, %v2562_v48 }
 0x421   :  { %v1187_v41 = vadd.f32 %v1170_v26, %v1139_v52  ;;  %v1188_v11 = vadd.f32 %v1175_v36, %v1140_v57  ;;  %v1134_v9 = vmul.f32 %v1133_v0, %v1093_v51  ;;  %v1230_v62 = vmul.f32 %v1225_v33, %v1208_v55  ;;  %v1308_v52 = vpop.permute.xlu0 %1307 }
 0x422   :  { %v2603_v45 = vrot.slane %v2584_v60, %v2662_v43  ;;  %v1186_v26 = vadd.f32 %v1165_v23, %v1138_v46  ;;  %v1184_v32 = vadd.f32 %v1155_v2, %v1136_v42  ;;  %v1185_v25 = vadd.f32 %v1160_v29, %v1137_v17 }
 0x423   :  { %v1240_v63 = vadd.f32 %v1232_v20, %v1188_v11  ;;  %v1239_v36 = vadd.f32 %v1231_v16, %v1187_v41  ;;  %v1135_v50 = vmul.f32 %v1133_v0, %v1098_v4  ;;  %v1283_v21 = vmul.f32 %v1277_v44, %v2571_v28 }
 0x424   :  { %v1284_v10 = vmul.f32 %v1277_v44, %v2558_v49  ;;  %v1238_v40 = vadd.f32 %v1230_v62, %v1186_v26  ;;  %v1141_v53 = vmul.f32 %v1133_v0, %v2550_v8  ;;  %v1335_v34 = vmul.f32 %v2603_v45, %v1316_v38 }
 0x425   :  { %v1182_v48 = vadd.f32 %v1145_v15, %v1134_v9  ;;  %v1228_v51 = vmul.f32 %v1225_v33, %v2573_v35  ;;  %v1229_v23 = vmul.f32 %v1225_v33, %v2575_v37  ;;  %v1233_v29 = vmul.f32 %v1225_v33, %v2554_v1  ;;  %v1248_v1 = vpop.permute.xlu1 %1247 }
 0x426   :  { %v1292_v55 = vadd.f32 %v1284_v10, %v1240_v63  ;;  %v1189_v2 = vadd.f32 %v2552_v13, %v1141_v53  ;;  %v1282_v4 = vmul.f32 %v1277_v44, %v2569_v39  ;;  %v1291_v28 = vadd.f32 %v1283_v21, %v1239_v36 }
 0x427   :  { %v1236_v22 = vadd.f32 %v1228_v51, %v1184_v32  ;;  %v1237_v49 = vadd.f32 %v1229_v23, %v1185_v25  ;;  %v1183_v31 = vadd.f32 %v1150_v12, %v1135_v50  ;;  %v1285_v8 = vmul.f32 %v1277_v44, %v2560_v24 }
 0x428   :  { %v1241_v61 = vadd.f32 %v1233_v29, %v1189_v2  ;;  %v1336_v38 = vmul.f32 %v2603_v45, %v2567_v58  ;;  %v1290_v35 = vadd.f32 %v1282_v4, %v1238_v40  ;;  %v1280_v37 = vmul.f32 %v1277_v44, %v2578_v18 }
 0x429   :  { %v1281_v15 = vmul.f32 %v1277_v44, %v1256_v56  ;;  %v1226_v0 = vmul.f32 %v1225_v33, %v1192_v54  ;;  %v1227_v13 = vmul.f32 %v1225_v33, %v1196_v6  ;;  %v1337_v39 = vmul.f32 %v2603_v45, %v1324_v27  ;;  %v1296_v27 = vpop.permute.xlu0 %1295  ;;  %v1300_v43 = vpop.permute.xlu1 %1299 }
 0x42a   :  { %v1293_v30 = vadd.f32 %v1285_v8, %v1241_v61  ;;  %v1344_v57 = vadd.f32 %v1336_v38, %v1292_v55  ;;  %v1334_v12 = vmul.f32 %v2603_v45, %v1312_v5  ;;  %v1343_v41 = vadd.f32 %v1335_v34, %v1291_v28 }
 0x42b   :  { %v1288_v42 = vadd.f32 %v1280_v37, %v1236_v22  ;;  %v1234_v24 = vadd.f32 %v1226_v0, %v1182_v48  ;;  %v1289_v11 = vadd.f32 %v1281_v15, %v1237_v49  ;;  %v1235_v17 = vadd.f32 %v1227_v13, %v1183_v31 }
 0x42c   :  { %v1345_v58 = vadd.f32 %v1337_v39, %v1293_v30  ;;  %v1342_v7 = vadd.f32 %v1334_v12, %v1290_v35  ;;  %v1332_v18 = vmul.f32 %v2603_v45, %v1304_v14  ;;  %v1278_v56 = vmul.f32 %v1277_v44, %v1244_v3  ;;  %v1511_v3 = vld [vmem:[%s2652_s3 + $0xc] sm:$0xf] }
 0x42d   :  { %v1333_v6 = vmul.f32 %v2603_v45, %v1308_v52  ;;  %v1279_v33 = vmul.f32 %v1277_v44, %v1248_v1  ;;  %v1330_v26 = vmul.f32 %v2603_v45, %v1296_v27  ;;  %v1331_v62 = vmul.f32 %v2603_v45, %v1300_v43  ;;  %v1361_v21 = vpop.permute.xlu0 %1360 }
 0x42e   :  { %v1349_v54 = vpack.c.bf16 %v1345_v58, %v1344_v57  ;;  %v1340_v20 = vadd.f32 %v1332_v18, %v1288_v42  ;;  %v1286_v46 = vadd.f32 %v1278_v56, %v1234_v24  ;;  %v1348_v16 = vpack.c.bf16 %v1343_v41, %v1342_v7 }
 0x42f   :  { %v1341_v9 = vadd.f32 %v1333_v6, %v1289_v11  ;;  %v1287_v63 = vadd.f32 %v1279_v33, %v1235_v17  ;;  %v1432_v2 = vmul.f32 %v2584_v60, %v2584_v60 }
 0x430   :  { %1718 = vtanh.bf16 %v1349_v54  ;;  %v1338_v14 = vadd.f32 %v1330_v26, %v1286_v46 }
 0x431   :  { %1720 = vtanh.bf16 %v1348_v16  ;;  %v1347_v36 = vpack.c.bf16 %v1341_v9, %v1340_v20  ;;  %v1339_v32 = vadd.f32 %v1331_v62, %v1287_v63  ;;  %v1434_v28 = vrot.slane %v1432_v2, 4 }
 0x433   :  { %1722 = vtanh.bf16 %v1347_v36  ;;  %v1346_v25 = vpack.c.bf16 %v1339_v32, %v1338_v14  ;;  %v1436_v31 = vsel %vm363_vm2, %v1434_v28, 0.0 }
 0x434   :  { %v1437_v38 = vrot.slane %v1436_v31, 4 }
 0x435   :  { %1724 = vtanh.bf16 %v1346_v25 }
 0x436   :  { %v1438_v15 = vadd.f32 %v1437_v38, %v1436_v31 }
 0x438   :  { %v1439_v52 = vrot.slane %v1438_v15, 2 }
 0x43a   :  { %v1440_v39 = vadd.f32 %v1439_v52, %v1438_v15 }
 0x43c   :  { %v1441_v41 = vrot.slane %v1440_v39, 1 }
 0x43e   :  { %v1719_v44 = vpop.eup %1718 }
 0x43f   :  { %1572 = vmatpush3.bf16.msra.mxu1 %v1719_v44  ;;  %v1721_v50 = vpop.eup %1720 }
 0x440   :  { %1573 = vmatprep.subr.bf16.mxu1 %v1735_v19 }
 0x441   :  { %v1723_v5 = vpop.eup %1722 }
 0x443   :  { %1574 = vmatpush3.bf16.msra.mxu1 %v1721_v50  ;;  %v1725_v45 = vpop.eup %1724 }
 0x444   :  { %1575 = vmatprep.subr.bf16.mxu1 %v1735_v19 }
 0x447   :  { %1576 = vmatpush3.bf16.msra.mxu1 %v1723_v5 }
 0x448   :  { %1577 = vmatprep.subr.bf16.mxu1 %v1735_v19 }
 0x44b   :  { %1578 = vmatpush3.bf16.msra.mxu1 %v1725_v45 }
 0x44e   :  { %1580 = vmatmul.mubr.msk.bf16.vlgmr.msra.gmra.mxu1 %vm311_vm1, %v1511_v3 }
 0x50e   :  { %v1400_v10 = vpop.f32.mrf.mxu1 }
 0x50f   :  { %v1401_v40 = vadd.f32 %v1400_v10, %v1361_v21 }
 0x510   :  { %v1581_v53 = vpop.f32.mrf.mxu1 }
 0x511   :  { %1726 = vtanh.f32 %v1401_v40  ;;  %v1411_v60 = vrot.slane %v1401_v40, 4 }
 0x512   :  { %v1403_v34 = vpop.f32.mrf.mxu1 }
 0x514   :  { %v1582_v48 = vpop.f32.mrf.mxu1 }
 0x51e   :  { %v1727_v51 = vpop.eup %1726 }
 0x51f   :  { %v1407_v23 = vmul.f32 1.442695, %v1727_v51  ;;  %v1414_v55 = vsel %vm363_vm2, %v1727_v51, 0.0 }
 0x520   :  { %v1415_v19 = vrot.slane %v1414_v55, 4 }
 0x521   :  { %1728 = vpow2.f32 %v1407_v23 }
 0x522   :  { %v1416_v29 = vadd.f32 %v1415_v19, %v1414_v55 }
 0x524   :  { %v1417_v4 = vrot.slane %v1416_v29, 2 }
 0x526   :  { %v1418_v22 = vadd.f32 %v1417_v4, %v1416_v29 }
 0x528   :  { %v1419_v49 = vrot.slane %v1418_v22, 1 }
 0x52a   :  { %v1420_v61 = vadd.f32 %v1419_v49, %v1418_v22 }
 0x52c   :  { %v1421_v8 = vadd.f32 %v1420_v61, %v2581_v59 }
 0x52e   :  { %v1729_v35 = vpop.eup %1728  ;;  %1447 = vst [vmem:[%s2654_s6 + $0x1] sm:$0x1] %v1421_v8 }
 0x52f   :  { %v1409_v37 = vmul.f32 %v1729_v35, %v2473_v47  ;;  %v1442_v47 = vadd.f32 %v1441_v41, %v1440_v39 }
 0x531   :  { %v1413_v0 = vadd.f32 %v1411_v60, %v1409_v37 }
 0x533   :  { %1422 = vst [vmem:[%s2653_s5] sm:$0xf] %v1413_v0  ;;  %v1424_v13 = vmul.f32 %v1413_v0, %v1413_v0 }
 0x535   :  { %v1425_v1 = vsel %vm363_vm2, %v1424_v13, 0.0 }
 0x536   :  { %v1426_v59 = vrot.slane %v1425_v1, 4 }
 0x538   :  { %v1427_v30 = vadd.f32 %v1426_v59, %v1425_v1 }
 0x53a   :  { %v1428_v57 = vrot.slane %v1427_v30, 2 }
 0x53c   :  { %v1429_v12 = vadd.f32 %v1428_v57, %v1427_v30 }
 0x53e   :  { %v1430_v42 = vrot.slane %v1429_v12, 1 }
 0x540   :  { %v1431_v24 = vadd.f32 %v1430_v42, %v1429_v12 }
 0x542   :  { %v1443_v11 = vadd.f32 %v1442_v47, %v1431_v24 }
 0x544   :  { %v1444_v17 = vmul.f32 -0.5, %v1443_v11 }
 0x546   :  { %v1514_v58 = vadd.f32 -7.351508, %v1444_v17 }
 0x548   :  { %1446 = vst [vmem:[%s2654_s6] sm:$0x1] %v1514_v58 }

</bundles_post_ra>
